<compile_context>
chip_gen: v7x
topology: tpu7x:2x2x1
jax: 0.10.0
libtpu: 0.0.40
codegen_flags: <defaults>
</compile_context>

<pallas_src>
import functools

import numpy as np
import jax
import jax.numpy as jnp
from jax.experimental import pallas as pl
from jax.experimental.pallas import tpu as pltpu


def _round_up(x, m):
    return ((x + m - 1) // m) * m


# ----------------------------------------------------------------------------
# Kernel
# ----------------------------------------------------------------------------
def _lmf_kernel(x_ref, w_ref, brow_ref, rred_ref, bias_ref, out_ref, *,
                num_modalities):
    """One batch tile per grid step; weights are VMEM-resident across steps.

    x    : (tile, pack*Ksum)            packed activations (pack batch rows/row)
    w    : (pack*Ksum, M*pack*rank*O)   block-diagonal fused projection weights
    brow : (1, M*pack*rank*O)           folded "ones column" bias rows
    rred : (pack*rank*O, pack*O)        block-diag identity stack (rank sum)
    bias : (1, pack*O)                  fusion bias, tiled over pack
    out  : (tile, pack*O)               lane-dense (pack*O == 128 when O == 32)
    """
    # Single fused MXU push for all modalities and all packed batch slots.
    h = jnp.dot(x_ref[...], w_ref[...],
                preferred_element_type=jnp.float32) + brow_ref[...]

    # Elementwise product over modalities; slices are multiples of 128 lanes.
    n = h.shape[-1] // num_modalities          # = pack * rank * out_dim
    fz = h[:, 0:n]
    for m in range(1, num_modalities):         # static unroll
        fz = fz * h[:, m * n:(m + 1) * n]

    # Rank reduction on the (otherwise idle) MXU; fusion bias in the epilogue.
    out = jnp.dot(fz, rred_ref[...],
                  preferred_element_type=jnp.float32) + bias_ref[...]
    out_ref[...] = out.astype(out_ref.dtype)


# ----------------------------------------------------------------------------
# One-time parameter packing (hoisted out of the per-call path)
# ----------------------------------------------------------------------------
def pack_lmf_params(params, *, act_dtype=jnp.float32, pack=None):
    """Fold + reshape the torch-layout parameters into kernel operands.

    Exact algebra used:
      cat([1, x]) @ F == x @ F[1:] + F[0]          (ones column -> bias row)
      fusion_weights folded into the vision factor (weight AND bias rows)
    Column order of the fused weight is (modality, pack-slot, rank, out_dim),
    which makes the modality product contiguous-slice and the output lane-dense.
    """
    vf = params["vision_factor"]
    tf_ = params["title_factor"]
    of = params["ocr_factor"]
    af = params["audio_factor"]
    w = params["fusion_weights"]        # (1, rank)
    b = params["fusion_bias"]           # (1, O)

    rank, _, out_dim = vf.shape
    factors = [vf * w.reshape(rank, 1, 1), tf_, of, af]   # fold fusion weights
    dims = [int(f.shape[1]) - 1 for f in factors]
    num_mod = len(factors)
    ksum = sum(dims)
    ro = rank * out_dim

    if pack is None:
        pack = max(1, 128 // out_dim)   # batch rows packed per output row

    # Per-modality weight (D_m, rank*O) rank-major + bias row (rank*O,).
    wms, brs = [], []
    for f in factors:
        d = int(f.shape[1]) - 1
        wms.append(jnp.transpose(f[:, 1:, :], (1, 0, 2)).reshape(d, ro))
        brs.append(f[:, 0, :].reshape(ro))

    # Block-diagonal fused weight over (modality, pack-slot).
    offs = [0]
    for d in dims[:-1]:
        offs.append(offs[-1] + d)
    w_pack = jnp.zeros((pack * ksum, num_mod * pack * ro), jnp.float32)
    for m in range(num_mod):
        for j in range(pack):
            w_pack = w_pack.at[
                j * ksum + offs[m]: j * ksum + offs[m] + dims[m],
                (m * pack + j) * ro: (m * pack + j + 1) * ro].set(wms[m])

    brow = jnp.concatenate([jnp.tile(brs[m], pack) for m in range(num_mod)])
    brow = brow.reshape(1, num_mod * pack * ro)

    # Rank-reduction matrix: block-diag of `pack` copies of an identity stack.
    eye_stack = jnp.tile(jnp.eye(out_dim, dtype=jnp.float32), (rank, 1))
    rred = jnp.zeros((pack * ro, pack * out_dim), jnp.float32)
    for j in range(pack):
        rred = rred.at[j * ro:(j + 1) * ro,
                       j * out_dim:(j + 1) * out_dim].set(eye_stack)

    bias_pack = jnp.tile(b, (1, pack))                      # (1, pack*O)

    return {
        "w": w_pack.astype(act_dtype),
        "brow": brow,                   # kept f32 (added after f32 accumulation)
        "rred": rred,                   # f32
        "bias": bias_pack,              # f32
        "dims": tuple(dims),
        "rank": int(rank),
        "out_dim": int(out_dim),
        "pack": int(pack),
        "num_modalities": int(num_mod),
        "act_dtype": act_dtype,
    }


# ----------------------------------------------------------------------------
# Forward wrapper
# ----------------------------------------------------------------------------
def lmf_forward(vision, title, ocr, audio, packed, *, block_rows=128):
    """LMF forward. `packed` comes from pack_lmf_params (computed once).

    block_rows is the batch-tile size in *packed* rows (pack original rows per
    packed row); default 128 packed rows == 512 original rows.  VMEM budget per
    tile at these defaults is well under 1 MiB, so the same tile fits v5e/v6e's
    128 MiB and v7x's 64 MiB — re-derive if rank or out_dim grow.
    """
    p = packed["pack"]
    out_dim = packed["out_dim"]
    num_mod = packed["num_modalities"]
    ro = packed["rank"] * out_dim
    ksum = int(sum(packed["dims"]))
    B = vision.shape[0]

    x = jnp.concatenate([vision, title, ocr, audio], axis=1)
    x = x.astype(packed["act_dtype"])                       # bf16 streaming opt

    # Pad batch so it packs into whole (block_rows, pack*Ksum) tiles.
    packed_rows = -(-B // p)
    block_rows = max(8, min(block_rows, _round_up(packed_rows, 8)))
    padded_rows = _round_up(packed_rows, block_rows)
    Bp = padded_rows * p
    if Bp != B:
        x = jnp.pad(x, ((0, Bp - B), (0, 0)))
    xp = x.reshape(padded_rows, p * ksum)                   # contiguous (free)

    grid = (padded_rows // block_rows,)

    flops = (2 * padded_rows * (p * ksum) * (num_mod * p * ro)
             + (num_mod - 1) * padded_rows * p * ro
             + 2 * padded_rows * (p * ro) * (p * out_dim))
    bytes_accessed = (int(xp.size) * xp.dtype.itemsize
                      + sum(int(packed[k].size) * packed[k].dtype.itemsize
                            for k in ("w", "brow", "rred", "bias"))
                      + padded_rows * p * out_dim * 4)

    # TODO(synk): if DMA stays exposed at production batch sizes, raise the
    # activation stream's pipeline depth via pipeline_mode=pl.Buffered(3).
    out = pl.pallas_call(
        functools.partial(_lmf_kernel, num_modalities=num_mod),
        out_shape=jax.ShapeDtypeStruct((padded_rows, p * out_dim), jnp.float32),
        grid_spec=pltpu.PrefetchScalarGridSpec(
            num_scalar_prefetch=0,
            grid=grid,
            in_specs=[
                # streamed activations (double-buffered by the pipeline)
                pl.BlockSpec((block_rows, p * ksum), lambda i: (i, 0)),
                # resident weights: constant block index -> loaded once
                pl.BlockSpec(packed["w"].shape, lambda i: (0, 0)),
                pl.BlockSpec(packed["brow"].shape, lambda i: (0, 0)),
                pl.BlockSpec(packed["rred"].shape, lambda i: (0, 0)),
                pl.BlockSpec(packed["bias"].shape, lambda i: (0, 0)),
            ],
            out_specs=pl.BlockSpec((block_rows, p * out_dim), lambda i: (i, 0)),
        ),
        compiler_params=pltpu.CompilerParams(
            dimension_semantics=("parallel",),   # megacore split on v7x
        ),
        cost_estimate=pl.CostEstimate(flops=flops, transcendentals=0,
                                      bytes_accessed=bytes_accessed),
    )(xp, packed["w"], packed["brow"], packed["rred"], packed["bias"])

    out = out.reshape(Bp, out_dim)       # byte-identical to the packed layout
    return out[:B] if Bp != B else out


# ----------------------------------------------------------------------------
# Pure-JAX reference (matches the torch forward exactly)
# ----------------------------------------------------------------------------
def lmf_reference(vision, title, ocr, audio, p):
    B = vision.shape[0]
    ones = jnp.ones((B, 1), jnp.float32)
    vh = jnp.concatenate([ones, vision], axis=1)
    th = jnp.concatenate([ones, title], axis=1)
    oh = jnp.concatenate([ones, ocr], axis=1)
    ah = jnp.concatenate([ones, audio], axis=1)
    fv = jnp.einsum("bd,rdo->rbo", vh, p["vision_factor"])
    ft = jnp.einsum("bd,rdo->rbo", th, p["title_factor"])
    fo = jnp.einsum("bd,rdo->rbo", oh, p["ocr_factor"])
    fa = jnp.einsum("bd,rdo->rbo", ah, p["audio_factor"])
    fz = fv * ft * fo * fa
    out = jnp.einsum("r,rbo->bo", p["fusion_weights"][0], fz) + p["fusion_bias"]
    return out.reshape(-1, p["fusion_bias"].shape[-1])


def init_params(key, hidden_dims, output_dim, rank):
    """Deterministic xavier-normal-like init matching torch parameter shapes."""
    ks = jax.random.split(key, 5)

    def xavier(k, shape):
        recep = int(np.prod(shape[2:])) if len(shape) > 2 else 1
        fan_in = shape[1] * recep
        fan_out = shape[0] * recep
        std = float(np.sqrt(2.0 / (fan_in + fan_out)))
        return std * jax.random.normal(k, shape, dtype=jnp.float32)

    dv, dt, do, da = hidden_dims
    return {
        "vision_factor": xavier(ks[0], (rank, dv + 1, output_dim)),
        "title_factor": xavier(ks[1], (rank, dt + 1, output_dim)),
        "ocr_factor": xavier(ks[2], (rank, do + 1, output_dim)),
        "audio_factor": xavier(ks[3], (rank, da + 1, output_dim)),
        "fusion_weights": xavier(ks[4], (1, rank)),
        "fusion_bias": jnp.zeros((1, output_dim), jnp.float32),
    }


if __name__ == "__main__":
    hidden_dims = (16, 24, 32, 8)
    output_dim = 32
    rank = 4          # rank * output_dim = 128 -> one vreg lane-block per modality
    batch = 64        # pack=4 -> 16 packed rows -> 2 grid steps with block_rows=8

    key = jax.random.PRNGKey(0)
    kp, kv, kt, ko, ka = jax.random.split(key, 5)

    params = init_params(kp, hidden_dims, output_dim, rank)
    packed = pack_lmf_params(params)          # one-time weight preprocessing

    vision = jax.random.normal(kv, (batch, hidden_dims[0]), dtype=jnp.float32)
    title = jax.random.normal(kt, (batch, hidden_dims[1]), dtype=jnp.float32)
    ocr = jax.random.normal(ko, (batch, hidden_dims[2]), dtype=jnp.float32)
    audio = jax.random.normal(ka, (batch, hidden_dims[3]), dtype=jnp.float32)

    out = lmf_forward(vision, title, ocr, audio, packed, block_rows=8)
    out = jax.block_until_ready(out)

    ref = lmf_reference(vision, title, ocr, audio, params)
    np.testing.assert_allclose(np.asarray(out), np.asarray(ref),
                               rtol=1e-4, atol=1e-5)
    print("KERNEL_OK")
</pallas_src>

<mosaic_0001>
module attributes {stable_mosaic.version = 11 : i64} {
  func.func @_lmf_kernel(%arg0: i32, %arg1: memref<8x320xf32, #tpu.memory_space<vmem>>, %arg2: memref<320x2048xf32, #tpu.memory_space<vmem>>, %arg3: memref<1x2048xf32, #tpu.memory_space<vmem>>, %arg4: memref<512x128xf32, #tpu.memory_space<vmem>>, %arg5: memref<1x128xf32, #tpu.memory_space<vmem>>, %arg6: memref<8x128xf32, #tpu.memory_space<vmem>>) attributes {dimension_semantics = [#tpu.dimension_semantics<parallel>], iteration_bounds = array<i64: 2>, scalar_prefetch = 0 : i64, scratch_operands = 0 : i64, tpu.core_type = #tpu.core_type<tc>, window_params = [{transform_indices = @transform_0, window_bounds = array<i64: 8, 320>}, {pipeline_mode = #tpu.pipeline_mode<synchronous>, transform_indices = @transform_1, window_bounds = array<i64: 320, 2048>}, {pipeline_mode = #tpu.pipeline_mode<synchronous>, transform_indices = @transform_2, window_bounds = array<i64: 1, 2048>}, {pipeline_mode = #tpu.pipeline_mode<synchronous>, transform_indices = @transform_3, window_bounds = array<i64: 512, 128>}, {pipeline_mode = #tpu.pipeline_mode<synchronous>, transform_indices = @transform_4, window_bounds = array<i64: 1, 128>}, {transform_indices = @transform_5, window_bounds = array<i64: 8, 128>}]} {
    %c0 = arith.constant 0 : index
    %c0_0 = arith.constant 0 : index
    %0 = vector.load %arg1[%c0, %c0_0] : memref<8x320xf32, #tpu.memory_space<vmem>>, vector<8x320xf32>
    %c0_1 = arith.constant 0 : index
    %c0_2 = arith.constant 0 : index
    %1 = vector.load %arg2[%c0_1, %c0_2] : memref<320x2048xf32, #tpu.memory_space<vmem>>, vector<320x2048xf32>
    %cst = arith.constant dense<0.000000e+00> : vector<8x2048xf32>
    %2 = tpu.matmul %0, %1, %cst {dimension_numbers = #tpu.dot_dimension_numbers<[1], [0], [0], [1], [0, 0, 1, 1], [], []>} : vector<8x320xf32>, vector<320x2048xf32>, vector<8x2048xf32> -> vector<8x2048xf32>
    %c0_3 = arith.constant 0 : index
    %c0_4 = arith.constant 0 : index
    %3 = vector.load %arg3[%c0_3, %c0_4] : memref<1x2048xf32, #tpu.memory_space<vmem>>, vector<1x2048xf32>
    %4 = vector.broadcast %3 : vector<1x2048xf32> to vector<8x2048xf32>
    %5 = arith.addf %2, %4 : vector<8x2048xf32>
    %6 = vector.extract_strided_slice %5 {offsets = [0, 0], sizes = [8, 512], strides = [1, 1]} : vector<8x2048xf32> to vector<8x512xf32>
    %7 = vector.extract_strided_slice %5 {offsets = [0, 512], sizes = [8, 512], strides = [1, 1]} : vector<8x2048xf32> to vector<8x512xf32>
    %8 = arith.mulf %6, %7 : vector<8x512xf32>
    %9 = vector.extract_strided_slice %5 {offsets = [0, 1024], sizes = [8, 512], strides = [1, 1]} : vector<8x2048xf32> to vector<8x512xf32>
    %10 = arith.mulf %8, %9 : vector<8x512xf32>
    %11 = vector.extract_strided_slice %5 {offsets = [0, 1536], sizes = [8, 512], strides = [1, 1]} : vector<8x2048xf32> to vector<8x512xf32>
    %12 = arith.mulf %10, %11 : vector<8x512xf32>
    %c0_5 = arith.constant 0 : index
    %c0_6 = arith.constant 0 : index
    %13 = vector.load %arg4[%c0_5, %c0_6] : memref<512x128xf32, #tpu.memory_space<vmem>>, vector<512x128xf32>
    %cst_7 = arith.constant dense<0.000000e+00> : vector<8x128xf32>
    %14 = tpu.matmul %12, %13, %cst_7 {dimension_numbers = #tpu.dot_dimension_numbers<[1], [0], [0], [1], [0, 0, 1, 1], [], []>} : vector<8x512xf32>, vector<512x128xf32>, vector<8x128xf32> -> vector<8x128xf32>
    %c0_8 = arith.constant 0 : index
    %c0_9 = arith.constant 0 : index
    %15 = vector.load %arg5[%c0_8, %c0_9] : memref<1x128xf32, #tpu.memory_space<vmem>>, vector<1x128xf32>
    %16 = vector.broadcast %15 : vector<1x128xf32> to vector<8x128xf32>
    %17 = arith.addf %14, %16 : vector<8x128xf32>
    %c0_10 = arith.constant 0 : index
    %c0_11 = arith.constant 0 : index
    %18 = vector.load %arg6[%c0_10, %c0_11] : memref<8x128xf32, #tpu.memory_space<vmem>>, vector<8x128xf32>
    tpu.vector_store %arg6[%c0_10, %c0_11], %17 {strides = array<i32>} : memref<8x128xf32, #tpu.memory_space<vmem>>, vector<8x128xf32>,
    return
  }
  func.func @transform_0(%arg0: i32) -> (i32, i32) {
    %c0_i32 = arith.constant 0 : i32
    %c0_i32_0 = arith.constant 0 : i32
    return %arg0, %c0_i32 : i32, i32
  }
  func.func @transform_1(%arg0: i32) -> (i32, i32) {
    %c0_i32 = arith.constant 0 : i32
    %c0_i32_0 = arith.constant 0 : i32
    %c0_i32_1 = arith.constant 0 : i32
    return %c0_i32, %c0_i32_0 : i32, i32
  }
  func.func @transform_2(%arg0: i32) -> (i32, i32) {
    %c0_i32 = arith.constant 0 : i32
    %c0_i32_0 = arith.constant 0 : i32
    %c0_i32_1 = arith.constant 0 : i32
    return %c0_i32, %c0_i32_0 : i32, i32
  }
  func.func @transform_3(%arg0: i32) -> (i32, i32) {
    %c0_i32 = arith.constant 0 : i32
    %c0_i32_0 = arith.constant 0 : i32
    %c0_i32_1 = arith.constant 0 : i32
    return %c0_i32, %c0_i32_0 : i32, i32
  }
  func.func @transform_4(%arg0: i32) -> (i32, i32) {
    %c0_i32 = arith.constant 0 : i32
    %c0_i32_0 = arith.constant 0 : i32
    %c0_i32_1 = arith.constant 0 : i32
    return %c0_i32, %c0_i32_0 : i32, i32
  }
  func.func @transform_5(%arg0: i32) -> (i32, i32) {
    %c0_i32 = arith.constant 0 : i32
    %c0_i32_0 = arith.constant 0 : i32
    return %arg0, %c0_i32 : i32, i32
  }
}

</mosaic_0001>

<bundles_post_ra>
// kernel: tpu_custom_call.1
= control target key start
LH: loop header
LB: loop body
LE: loop exit
PB: predicated region body
PF: predicated region fallthrough
CT: control target
= control target key end

     0   :  { %10 = vsyncpa [#allocation3], 0  ;;  %s4065_s0 = inlined_call_operand.hbm [shape: f32[16,320], index: 0, kind: input, shape index: {}]   ;;  %s4066_s1 = inlined_call_operand.hbm [shape: f32[320,2048], index: 1, kind: input, shape index: {}]   ;;  %s4067_s2 = inlined_call_operand.hbm [shape: f32[1,2048], index: 2, kind: input, shape index: {}]   ;;  %s4068_s3 = inlined_call_operand.hbm [shape: f32[512,128], index: 3, kind: input, shape index: {}]   ;;  %s4069_s4 = inlined_call_operand.hbm [shape: f32[1,128], index: 4, kind: input, shape index: {}]   ;;  %s4070_s5 = inlined_call_operand.hbm [shape: f32[16,128], index: 5, kind: output, shape index: {}]  }
   0x1   :  { %12 = vsyncpa [#allocation3 + $0x1], 0 }
   0x2   :  { %13 = vsyncpa [#allocation6], 0 }
   0x3   :  { %14 = vsyncpa [#allocation9], 0 }
   0x4   :  { %15 = vsyncpa [#allocation4], 0 }
   0x5   :  { %17 = vsyncpa [#allocation4 + $0x1], 0  ;;  %s3696_s18 = smov 0   ;;  %s3698_s19 = smov 0  }
   0x6   :  { %s3700_s20 = smov 0   ;;  %s3702_s21 = smov 0  }
   0x7 LB: > { %s3656_s22 = smov [#allocation5]   ;;  %s3717_s24 = sadd.s32 4294967295, %s3654_s21   ;;  %s3654_s21 = sphi %s3702_s21, %s4093_s21   ;;  %s3650_s20 = sphi %s3700_s20, %s4092_s20   ;;  %s3646_s19 = sphi %s3698_s19, %s4091_s19   ;;  %s3642_s18 = sphi %s3696_s18, %s4090_s18  }
   0x8   : > { %s176_s23 = sshll.u32 %s3656_s22, 4  ;;  %p2509_p0 = scmp.ge.s32.totalorder %s3654_s21, 1  ;;  %s3722_s23 = int_to_ptr.vmem [resolvable:$true] %s176_s23 }
   0x9   : > { %p4071_p1 = scmp.eq.s32.totalorder %s3717_s24, 0  ;;  %p164_p2 = scmp.lt.s32.totalorder %s3654_s21, 3 }
   0xa   : > { %s3657_s26 = smov [#allocation8]   ;;  %s3658_s29 = smov [#allocation7]  }
   0xb   : > { %p3724_p3 = pnand %p2509_p0, %p164_p2  ;;  %s200_s27 = sshll.u32 %s3657_s26, 4  ;;  %s3737_s27 = int_to_ptr.vmem [resolvable:$true] %s200_s27 }
   0xc   : > { %s3739_s30 = sshll.u32 %s3658_s29, 4  ;;  %s3438_s8 = scalar_lea.hbm %s4066_s1, 81920  ;;  %s191_s30 = int_to_ptr.vmem [resolvable:$true] %s3739_s30 }
   0xd   : > { %s4074_s25 = scalar_select %p3724_p3, 1, 0 }
   0xe   : > { %p3364_p5 = pneg %p3724_p3  ;;  %p3439_p7 = scmp.ne.s32.totalorder %s4066_s1, %s3438_s8 }
   0xf   : > { %p3445_p11 = scmp.lt.u32.totalorder %s3438_s8, %s4066_s1 }
  0x10   : > { %p3733_p6 = pnand %p3364_p5, %p4071_p1 }
  0x12   : > { %p3749_p8 = pneg %p3733_p6 }
  0x14   : > { %p3441_p9 = pnand %p3749_p8, %p3439_p7 }
  0x16   : > { %p3442_p10 = pneg %p3441_p9 }
  0x18   : > { %p3447_p12 = pnand %p3445_p11, %p3442_p10 }
  0x1a   : > { %3450 = shalt.err (!%p3447_p12)
}
  0x1b   : > { %s3451_s14 = scalar_lea.vmem %s3722_s23, 81920  ;;  %p3459_p5 = scmp.lt.s32.totalorder %s3722_s23, %s3722_s23 }
  0x1c   : > { %p3452_p13 = scmp.ne.s32.totalorder %s3722_s23, %s3451_s14  ;;  %p3460_p4 = scmp.lt.s32.totalorder %s3451_s14, %s3451_s14 }
  0x1e   : > { %p3454_p0 = pnand %p3452_p13, %p3749_p8  ;;  %p3461_p7 = por %p3460_p4, %p3459_p5 }
  0x20   : > { %p3455_p2 = pneg %p3454_p0 }
  0x22   : > { %p3462_p9 = pnand %p3461_p7, %p3455_p2 }
  0x24   : > { %3465 = shalt.err (!%p3462_p9)
}
  0x25   : > { %s3659_s15 = smov 2048   ;;  %s3660_s16 = smov 128  }
  0x26   : > { %3367 = dma.hbm_to_vmem [thread:$0]  (!%p3733_p6), %s4066_s1, 81920, %s3722_s23, [#allocation6], %s3659_s15, %s3659_s15, %s3660_s16  }
  0x27   : > { %s3466_s6 = scalar_lea.hbm %s4068_s3, 8192 }
  0x28   : > { %p3467_p4 = scmp.ne.s32.totalorder %s4068_s3, %s3466_s6  ;;  %p3473_p12 = scmp.lt.u32.totalorder %s3466_s6, %s4068_s3 }
  0x2a   : > { %p3469_p10 = pnand %p3467_p4, %p3749_p8 }
  0x2c   : > { %p3470_p11 = pneg %p3469_p10 }
  0x2e   : > { %p3475_p13 = pnand %p3473_p12, %p3470_p11 }
  0x30   : > { %3478 = shalt.err (!%p3475_p13)
}
  0x31   : > { %s3479_s23 = scalar_lea.vmem %s3737_s27, 8192  ;;  %p3487_p7 = scmp.lt.s32.totalorder %s3737_s27, %s3737_s27 }
  0x32   : > { %p3480_p0 = scmp.ne.s32.totalorder %s3737_s27, %s3479_s23  ;;  %p3488_p9 = scmp.lt.s32.totalorder %s3479_s23, %s3479_s23 }
  0x34   : > { %p3482_p2 = pnand %p3480_p0, %p3749_p8  ;;  %p3489_p4 = por %p3488_p9, %p3487_p7 }
  0x36   : > { %p3483_p5 = pneg %p3482_p2 }
  0x38   : > { %p3490_p10 = pnand %p3489_p4, %p3483_p5 }
  0x3a   : > { %3493 = shalt.err (!%p3490_p10)
}
  0x3b   : > { %s3661_s12 = smov 8   ;;  %s3662_s15 = smov [#allocation10]  }
  0x3c   : > { %3373 = dma.hbm_to_vmem [thread:$0]  (!%p3733_p6), %s4068_s3, 8192, %s3737_s27, [#allocation9], %s3660_s16, %s3660_s16, %s3661_s12  }
  0x3d   : > { %s214_s17 = sshll.u32 %s3662_s15, 4  ;;  %s3494_s29 = scalar_lea.hbm %s4067_s2, 256  ;;  %s215_s17 = int_to_ptr.vmem [resolvable:$true] %s214_s17 }
  0x3e   : > { %p3495_p11 = scmp.ne.s32.totalorder %s4067_s2, %s3494_s29  ;;  %p3501_p0 = scmp.lt.u32.totalorder %s3494_s29, %s4067_s2 }
  0x40   : > { %p3497_p12 = pnand %p3495_p11, %p3749_p8 }
  0x42   : > { %p3498_p13 = pneg %p3497_p12 }
  0x44   : > { %p3503_p2 = pnand %p3501_p0, %p3498_p13 }
  0x46   : > { %3506 = shalt.err (!%p3503_p2)
}
  0x47   : > { %s3507_s27 = scalar_lea.vmem %s191_s30, 256  ;;  %p3515_p4 = scmp.lt.s32.totalorder %s191_s30, %s191_s30 }
  0x48   : > { %p3508_p5 = scmp.ne.s32.totalorder %s191_s30, %s3507_s27  ;;  %p3516_p10 = scmp.lt.s32.totalorder %s3507_s27, %s3507_s27 }
  0x4a   : > { %p3510_p7 = pnand %p3508_p5, %p3749_p8  ;;  %p3517_p1 = por %p3516_p10, %p3515_p4 }
  0x4c   : > { %p3511_p9 = pneg %p3510_p7 }
  0x4e   : > { %p3518_p3 = pnand %p3517_p1, %p3511_p9 }
  0x50   : > { %3521 = shalt.err (!%p3518_p3)
}
  0x51   : > { %3370 = dma.hbm_to_vmem [thread:$0]  (!%p3733_p6), %s4067_s2, 256, %s191_s30, [#allocation6]  }
  0x52   : > { %s3522_s13 = scalar_lea.hbm %s4069_s4, 16 }
  0x53   : > { %p3523_p11 = scmp.ne.s32.totalorder %s4069_s4, %s3522_s13  ;;  %p3529_p3 = scmp.lt.u32.totalorder %s3522_s13, %s4069_s4 }
  0x55   : > { %p3525_p12 = pnand %p3523_p11, %p3749_p8 }
  0x57   : > { %p3526_p1 = pneg %p3525_p12 }
  0x59   : > { %p3531_p13 = pnand %p3529_p3, %p3526_p1 }
  0x5b   : > { %3534 = shalt.err (!%p3531_p13)
}
  0x5c   : > { %s3535_s29 = scalar_lea.vmem %s215_s17, 16  ;;  %s3542_s30 = scalar_lea.vmem %s215_s17, 32 }
  0x5d   : > { %p3536_p0 = scmp.ne.s32.totalorder %s215_s17, %s3535_s29  ;;  %p3543_p7 = scmp.lt.s32.totalorder %s215_s17, %s215_s17 }
  0x5e   : > { %p3544_p9 = scmp.lt.s32.totalorder %s3542_s30, %s3535_s29 }
  0x5f   : > { %p3538_p2 = pnand %p3536_p0, %p3749_p8 }
  0x60   : > { %p3545_p4 = por %p3544_p9, %p3543_p7 }
  0x61   : > { %p3539_p5 = pneg %p3538_p2 }
  0x63   : > { %p3546_p10 = pnand %p3545_p4, %p3539_p5 }
  0x65   : > { %3549 = shalt.err (!%p3546_p10)
}
  0x66   : > { %3376 = dma.hbm_to_vmem [thread:$0]  (!%p3733_p6), %s4069_s4, 16, %s215_s17, [#allocation9]  }
  0x67   : > { %s2508_s11 = sadd.s32 4294967294, %s3654_s21   ;;  %s3832_s28 = sadd.s32 1, %s3654_s21  }
  0x68   : > { %s30_s8 = sadd.s32 1, %s3650_s20  ;;  %s27_s9 = ssub.s32 %s3654_s21, %s3832_s28 }
  0x69   : > { %p37_p8 = scmp.ne.s32.totalorder %s3650_s20, %s3646_s19  ;;  %p28_p11 = scmp.eq.s32.totalorder %s27_s9, 0 }
  0x6a   : > { %p38_p12 = scmp.eq.s32.totalorder %s3654_s21, 0  ;;  %p43_p1 = scmp.ne.s32.totalorder %s3646_s19, %s3642_s18 }
  0x6b   : > { %p151_p3 = scmp.eq.s32.totalorder %s3717_s24, 1  ;;  %p4077_p0 = scmp.eq.s32.totalorder %s3717_s24, 0 }
  0x6c   : > { %s3844_s27 = scalar_select %p28_p11, %s3650_s20, %s30_s8  }
  0x6d   : > { %p39_p13 = por %p38_p12, %p37_p8  ;;  %p3848_p2 = por %p4077_p0, %p43_p1 }
  0x6e   : > { %p3852_p6 = por %p151_p3, %p37_p8  ;;  %p157_p5 = scmp.eq.s32.totalorder %s2508_s11, 1 }
  0x6f   : > { %p3389_p7 = scmp.lt.s32.totalorder %s3654_s21, 2  ;;  %s225_s10 = sand.u32 1, %s3650_s20  }
  0x70   : > { %s4079_s17 = scalar_select %p3852_p6, 1, 0 }
  0x71   : > { %p3858_p9 = por %p157_p5, %p43_p1  ;;  %s3341_s12 = smul.u32 24, %s225_s10 }
  0x72   : > { %p3862_p4 = pnand %p3389_p7, %p39_p13  ;;  %s3342_s14 = smul.u32 384, %s3654_s21 }
  0x73   : > { %s4080_s23 = scalar_select %p3858_p9, 1, 0 }
  0x74   : > { %s3870_s26 = scalar_lea.hbm %s4065_s0, %s3342_s14  ;;  %s229_s29 = scalar_lea.vmem [#allocation2], %s3341_s12 }
  0x75   : > { %s237_s30 = sshll.u32 %s229_s29, 4  ;;  %s226_s6 = scalar_lea.sflag [#allocation3], %s225_s10  ;;  %s3872_s30 = int_to_ptr.vmem [resolvable:$true] %s237_s30 }
  0x76   : > { %s3550_s7 = scalar_lea.hbm %s3870_s26, 384  ;;  %p3552_p8 = pneg %p3862_p4 }
  0x77   : > { %p3551_p10 = scmp.ne.s32.totalorder %s3870_s26, %s3550_s7  ;;  %s3555_s9 = scalar_lea.hbm %s4065_s0, 768 }
  0x78   : > { %p3556_p1 = scmp.lt.u32.totalorder %s3870_s26, %s4065_s0  ;;  %p3557_p3 = scmp.lt.u32.totalorder %s3555_s9, %s3550_s7 }
  0x79   : > { %p3553_p11 = pnand %p3552_p8, %p3551_p10  ;;  %p3559_p0 = scmp.lt.u32.totalorder %s3550_s7, %s3870_s26 }
  0x7a   : > { %p3558_p13 = por %p3557_p3, %p3556_p1 }
  0x7b   : > { %p3554_p12 = pneg %p3553_p11 }
  0x7c   : > { %p3560_p5 = por %p3559_p0, %p3558_p13 }
  0x7e   : > { %p3561_p7 = pnand %p3560_p5, %p3554_p12 }
  0x80   : > { %3564 = shalt.err (!%p3561_p7)
}
  0x81   : > { %s3565_s10 = scalar_lea.vmem %s3872_s30, 384  ;;  %s3663_s12 = smov [#allocation2]  }
  0x82   : > { %p3566_p10 = scmp.ne.s32.totalorder %s3872_s30, %s3565_s10  ;;  %s3570_s22 = sshll.u32 %s3663_s12, 4  ;;  %s3571_s22 = int_to_ptr.vmem [resolvable:$false] %s3570_s22 }
  0x83   : > { %s3572_s29 = scalar_lea.vmem %s3571_s22, 768  ;;  %p3573_p6 = scmp.lt.s32.totalorder %s3872_s30, %s3571_s22 }
  0x84   : > { %p3568_p11 = pnand %p3566_p10, %p3552_p8  ;;  %p3574_p1 = scmp.lt.s32.totalorder %s3572_s29, %s3565_s10 }
  0x86   : > { %p3569_p9 = pneg %p3568_p11  ;;  %p3575_p3 = por %p3574_p1, %p3573_p6 }
  0x88   : > { %p3576_p13 = pnand %p3575_p3, %p3569_p9 }
  0x8a   : > { %3579 = shalt.err (!%p3576_p13)
}
  0x8b   : > { %3380 = dma.hbm_to_vmem [thread:$0]  (!%p3862_p4), %s3870_s26, 384, %s3872_s30, %s226_s6  }
  0x8c   : > { %p4082_p12 = scmp.ne.s32.totalorder %s4074_s25, 0 }
  0x8d   : > { %s3902_s7 = sand.u32 (!%p4082_p12), 1, %s3646_s19  }
  0x8e   : > { %246 = sbr.rel (%p4082_p12) target bundleno = 931 (0x3a3), region = 40  ;;  %s249_s8 = scalar_lea.sflag (!%p4082_p12), [#allocation3], %s3902_s7 }
  0x8f   : > { %s3343_s11 = smul.u32 (!%p4082_p12), 24, %s3902_s7 }
  0x91   : > { %s3906_s9 = scalar_lea.vmem (!%p4082_p12), [#allocation2], %s3343_s11 }
  0x95   : > { %3625 = dma.done.wait (%p3848_p2), %s249_s8, 384  }
  0x96   : > { %3627 = vsyncadd (%p3848_p2), %s249_s8, 4294966912  ;;  %p4083_p6 = scmp.eq.s32.totalorder %s3717_s24, 0 }
  0x98   : > { %3629 = dma.done.wait (%p4083_p6), [#allocation6], 82176   ;;  %p4084_p9 = pmov %p4083_p6 }
  0x99   : > { %p4085_p4 = pmov %p4083_p6 }
  0x9a   : > { %3631 = vsyncadd (%p4084_p9), [#allocation6], 4294885120 }
  0x9b   : > { %3633 = dma.done.wait (%p4085_p4), [#allocation9], 8208   ;;  %p4086_p8 = pmov %p4085_p4 }
  0x9c   : > { %v299_v0 = vld [vmem:[#allocation5 + $0x8] sm:$0xff]  ;;  %v301_v2 = vld [vmem:[#allocation5 + $0x18] sm:$0xff]  ;;  %v298_v5 = vld [vmem:[#allocation5] sm:$0xff]  ;;  %vm1022_vm0 = vcmask 523264   ;;  %s2521_s25 = sshll.u32 %s3902_s7, 3  ;;  %s2532_s16 = sshll.u32 %s3717_s24, 7 }
  0x9d   : > { %3635 = vsyncadd (%p4086_p8), [#allocation9], 4294959088  ;;  %v315_v1 = vld [vmem:[#allocation5 + $0x88] sm:$0xff]  ;;  %v317_v4 = vld [vmem:[#allocation5 + $0x98] sm:$0xff]  ;;  %s294_s13 = scalar_lea.vmem [#allocation11], %s2521_s25  ;;  %s4021_s14 = scalar_lea.hbm %s4070_s5, %s2532_s16 }
  0x9e   : > { %v2605_v3 = vpack.c.bf16 %v315_v1, %v299_v0  ;;  %v314_v6 = vld [vmem:[#allocation5 + $0x80] sm:$0xff]  ;;  %v2685_v7 = vpack.c.bf16 %v317_v4, %v301_v2  ;;  %v300_v9 = vld [vmem:[#allocation5 + $0x10] sm:$0xff]  ;;  %v331_v11 = vld [vmem:[#allocation5 + $0x108] sm:$0xff]  ;;  %s2400_s26 = sshll.u32 %s294_s13, 4  ;;  %s2387_s15 = scalar_lea.sflag [#allocation4], %s3902_s7  ;;  %s4023_s26 = int_to_ptr.vmem [resolvable:$true] %s2400_s26 }
  0x9f   : > { %v2607_v8 = vpack.c.bf16 %v314_v6, %v298_v5  ;;  %v316_v10 = vld [vmem:[#allocation5 + $0x90] sm:$0xff]  ;;  %v347_v13 = vld [vmem:[#allocation5 + $0x188] sm:$0xff]  ;;  %v333_v14 = vld [vmem:[#allocation5 + $0x118] sm:$0xff]  ;;  %s3580_s10 = scalar_lea.vmem %s4023_s26, 128  ;;  %p4087_p0 = scmp.ne.s32.totalorder %s4079_s17, 0 }
  0xa0   : > { %2606 = vmatprep.subr.bf16.mxu0 %v2605_v3  ;;  %v2687_v12 = vpack.c.bf16 %v316_v10, %v300_v9  ;;  %v349_v15 = vld [vmem:[#allocation5 + $0x198] sm:$0xff]  ;;  %2686 = vmatprep.subr.bf16.mxu1 %v2685_v7  ;;  %v2609_v16 = vpack.c.bf16 %v347_v13, %v331_v11  ;;  %v330_v18 = vld [vmem:[#allocation5 + $0x100] sm:$0xff]  ;;  %v332_v20 = vld [vmem:[#allocation5 + $0x110] sm:$0xff]  ;;  %p3581_p2 = scmp.ne.s32.totalorder %s4023_s26, %s3580_s10  ;;  %s3665_s24 = smov [#allocation11]  }
  0xa1   : > { %2608 = vmatpush1.bf16.msra.mxu0 %v2607_v8  ;;  %v2689_v17 = vpack.c.bf16 %v349_v15, %v333_v14  ;;  %v346_v19 = vld [vmem:[#allocation5 + $0x180] sm:$0xff]  ;;  %v348_v22 = vld [vmem:[#allocation5 + $0x190] sm:$0xff]  ;;  %v363_v23 = vld [vmem:[#allocation5 + $0x208] sm:$0xff]  ;;  %s3584_s12 = sshll.u32 %s3665_s24, 4  ;;  %s3585_s12 = int_to_ptr.vmem [resolvable:$false] %s3584_s12 }
  0xa2   : > { %2688 = vmatpush1.bf16.msra.mxu1 %v2687_v12  ;;  %v2611_v21 = vpack.c.bf16 %v346_v19, %v330_v18  ;;  %v379_v24 = vld [vmem:[#allocation5 + $0x288] sm:$0xff]  ;;  %2610 = vmatprep.subr.bf16.mxu0 %v2609_v16  ;;  %v2691_v25 = vpack.c.bf16 %v348_v22, %v332_v20  ;;  %v365_v27 = vld [vmem:[#allocation5 + $0x218] sm:$0xff]  ;;  %v362_v29 = vld [vmem:[#allocation5 + $0x200] sm:$0xff]  ;;  %p3582_p5 = pnand %p3581_p2, %p4087_p0  ;;  %s3586_s22 = scalar_lea.vmem %s3585_s12, 256 }
  0xa3   : > { %2690 = vmatprep.subr.bf16.mxu1 %v2689_v17  ;;  %v2613_v26 = vpack.c.bf16 %v379_v24, %v363_v23  ;;  %v381_v28 = vld [vmem:[#allocation5 + $0x298] sm:$0xff]  ;;  %v378_v31 = vld [vmem:[#allocation5 + $0x280] sm:$0xff]  ;;  %v364_v32 = vld [vmem:[#allocation5 + $0x210] sm:$0xff]  ;;  %p3587_p10 = scmp.lt.s32.totalorder %s4023_s26, %s3585_s12  ;;  %p3588_p11 = scmp.lt.s32.totalorder %s3586_s22, %s3580_s10 }
  0xa4   : > { %v2693_v30 = vpack.c.bf16 %v381_v28, %v365_v27  ;;  %v380_v33 = vld [vmem:[#allocation5 + $0x290] sm:$0xff]  ;;  %v2615_v34 = vpack.c.bf16 %v378_v31, %v362_v29  ;;  %v395_v35 = vld [vmem:[#allocation5 + $0x308] sm:$0xff]  ;;  %v397_v37 = vld [vmem:[#allocation5 + $0x318] sm:$0xff]  ;;  %p3583_p7 = pneg %p3582_p5 }
  0xa5   : > { %2612 = vmatpush1.bf16.msra.mxu0 %v2611_v21  ;;  %v411_v36 = vld [vmem:[#allocation5 + $0x388] sm:$0xff]  ;;  %v2695_v38 = vpack.c.bf16 %v380_v33, %v364_v32  ;;  %v413_v40 = vld [vmem:[#allocation5 + $0x398] sm:$0xff]  ;;  %v394_v41 = vld [vmem:[#allocation5 + $0x300] sm:$0xff]  ;;  %p3589_p1 = por %p3588_p11, %p3587_p10 }
  0xa6   : > { %2692 = vmatpush1.bf16.msra.mxu1 %v2691_v25  ;;  %2614 = vmatprep.subr.bf16.mxu0 %v2613_v26  ;;  %v2617_v39 = vpack.c.bf16 %v411_v36, %v395_v35  ;;  %v410_v42 = vld [vmem:[#allocation5 + $0x380] sm:$0xff]  ;;  %v2697_v43 = vpack.c.bf16 %v413_v40, %v397_v37  ;;  %v396_v44 = vld [vmem:[#allocation5 + $0x310] sm:$0xff]  ;;  %v427_v46 = vld [vmem:[#allocation5 + $0x408] sm:$0xff] }
  0xa7   : > { %2694 = vmatprep.subr.bf16.mxu1 %v2693_v30  ;;  %v412_v45 = vld [vmem:[#allocation5 + $0x390] sm:$0xff]  ;;  %v443_v47 = vld [vmem:[#allocation5 + $0x488] sm:$0xff]  ;;  %v429_v48 = vld [vmem:[#allocation5 + $0x418] sm:$0xff]  ;;  %v2619_v50 = vpack.c.bf16 %v410_v42, %v394_v41  ;;  %p3590_p3 = pnand %p3589_p1, %p3583_p7 }
  0xa8   : > { %v445_v49 = vld [vmem:[#allocation5 + $0x498] sm:$0xff]  ;;  %v2699_v51 = vpack.c.bf16 %v412_v45, %v396_v44  ;;  %v2621_v52 = vpack.c.bf16 %v443_v47, %v427_v46  ;;  %v426_v53 = vld [vmem:[#allocation5 + $0x400] sm:$0xff]  ;;  %v428_v55 = vld [vmem:[#allocation5 + $0x410] sm:$0xff] }
  0xa9   : > { %2616 = vmatpush1.bf16.msra.mxu0 %v2615_v34  ;;  %v442_v54 = vld [vmem:[#allocation5 + $0x480] sm:$0xff]  ;;  %v2701_v56 = vpack.c.bf16 %v445_v49, %v429_v48  ;;  %v444_v57 = vld [vmem:[#allocation5 + $0x490] sm:$0xff]  ;;  %v459_v58 = vld [vmem:[#allocation5 + $0x508] sm:$0xff] }
  0xaa   : > { %2696 = vmatpush1.bf16.msra.mxu1 %v2695_v38  ;;  %2618 = vmatprep.subr.bf16.mxu0 %v2617_v39  ;;  %v475_v59 = vld [vmem:[#allocation5 + $0x588] sm:$0xff]  ;;  %v461_v60 = vld [vmem:[#allocation5 + $0x518] sm:$0xff]  ;;  %v2623_v62 = vpack.c.bf16 %v442_v54, %v426_v53  ;;  %v2703_v63 = vpack.c.bf16 %v444_v57, %v428_v55  ;;  %v458_v1 = vld [vmem:[#allocation5 + $0x500] sm:$0xff] }
  0xab   : > { %2698 = vmatprep.subr.bf16.mxu1 %v2697_v43  ;;  %v477_v61 = vld [vmem:[#allocation5 + $0x598] sm:$0xff]  ;;  %v2625_v0 = vpack.c.bf16 %v475_v59, %v459_v58  ;;  %v474_v2 = vld [vmem:[#allocation5 + $0x580] sm:$0xff]  ;;  %v460_v3 = vld [vmem:[#allocation5 + $0x510] sm:$0xff] }
  0xac   : > { %v2705_v4 = vpack.c.bf16 %v477_v61, %v461_v60  ;;  %v476_v5 = vld [vmem:[#allocation5 + $0x590] sm:$0xff]  ;;  %v491_v6 = vld [vmem:[#allocation5 + $0x608] sm:$0xff]  ;;  %v493_v8 = vld [vmem:[#allocation5 + $0x618] sm:$0xff]  ;;  %v2627_v10 = vpack.c.bf16 %v474_v2, %v458_v1 }
  0xad   : > { %2620 = vmatpush1.bf16.msra.mxu0 %v2619_v50  ;;  %v507_v7 = vld [vmem:[#allocation5 + $0x688] sm:$0xff]  ;;  %v509_v9 = vld [vmem:[#allocation5 + $0x698] sm:$0xff]  ;;  %v2707_v11 = vpack.c.bf16 %v476_v5, %v460_v3  ;;  %v490_v13 = vld [vmem:[#allocation5 + $0x600] sm:$0xff] }
  0xae   : > { %2700 = vmatpush1.bf16.msra.mxu1 %v2699_v51  ;;  %2622 = vmatprep.subr.bf16.mxu0 %v2621_v52  ;;  %v2629_v12 = vpack.c.bf16 %v507_v7, %v491_v6  ;;  %v506_v14 = vld [vmem:[#allocation5 + $0x680] sm:$0xff]  ;;  %v492_v15 = vld [vmem:[#allocation5 + $0x610] sm:$0xff]  ;;  %v2709_v16 = vpack.c.bf16 %v509_v9, %v493_v8  ;;  %v523_v18 = vld [vmem:[#allocation5 + $0x708] sm:$0xff] }
  0xaf   : > { %2702 = vmatprep.subr.bf16.mxu1 %v2701_v56  ;;  %v508_v17 = vld [vmem:[#allocation5 + $0x690] sm:$0xff]  ;;  %v539_v19 = vld [vmem:[#allocation5 + $0x788] sm:$0xff]  ;;  %v525_v20 = vld [vmem:[#allocation5 + $0x718] sm:$0xff]  ;;  %v2631_v22 = vpack.c.bf16 %v506_v14, %v490_v13 }
  0xb0   : > { %v541_v21 = vld [vmem:[#allocation5 + $0x798] sm:$0xff]  ;;  %v2711_v23 = vpack.c.bf16 %v508_v17, %v492_v15  ;;  %v2633_v24 = vpack.c.bf16 %v539_v19, %v523_v18  ;;  %v522_v25 = vld [vmem:[#allocation5 + $0x700] sm:$0xff]  ;;  %v524_v27 = vld [vmem:[#allocation5 + $0x710] sm:$0xff] }
  0xb1   : > { %2624 = vmatpush1.bf16.msra.mxu0 %v2623_v62  ;;  %v538_v26 = vld [vmem:[#allocation5 + $0x780] sm:$0xff]  ;;  %v2713_v28 = vpack.c.bf16 %v541_v21, %v525_v20  ;;  %v540_v29 = vld [vmem:[#allocation5 + $0x790] sm:$0xff]  ;;  %v555_v30 = vld [vmem:[#allocation5 + $0x808] sm:$0xff] }
  0xb2   : > { %2704 = vmatpush1.bf16.msra.mxu1 %v2703_v63  ;;  %2626 = vmatprep.subr.bf16.mxu0 %v2625_v0  ;;  %v571_v31 = vld [vmem:[#allocation5 + $0x888] sm:$0xff]  ;;  %v557_v32 = vld [vmem:[#allocation5 + $0x818] sm:$0xff]  ;;  %v2635_v34 = vpack.c.bf16 %v538_v26, %v522_v25  ;;  %v2715_v35 = vpack.c.bf16 %v540_v29, %v524_v27  ;;  %v554_v37 = vld [vmem:[#allocation5 + $0x800] sm:$0xff] }
  0xb3   : > { %2706 = vmatprep.subr.bf16.mxu1 %v2705_v4  ;;  %v573_v33 = vld [vmem:[#allocation5 + $0x898] sm:$0xff]  ;;  %v2637_v36 = vpack.c.bf16 %v571_v31, %v555_v30  ;;  %v570_v38 = vld [vmem:[#allocation5 + $0x880] sm:$0xff]  ;;  %v556_v39 = vld [vmem:[#allocation5 + $0x810] sm:$0xff] }
  0xb4   : > { %v2717_v40 = vpack.c.bf16 %v573_v33, %v557_v32  ;;  %v572_v41 = vld [vmem:[#allocation5 + $0x890] sm:$0xff]  ;;  %v587_v42 = vld [vmem:[#allocation5 + $0x908] sm:$0xff]  ;;  %v589_v44 = vld [vmem:[#allocation5 + $0x918] sm:$0xff]  ;;  %v2639_v46 = vpack.c.bf16 %v570_v38, %v554_v37 }
  0xb5   : > { %2628 = vmatpush1.bf16.msra.mxu0 %v2627_v10  ;;  %v603_v43 = vld [vmem:[#allocation5 + $0x988] sm:$0xff]  ;;  %v605_v45 = vld [vmem:[#allocation5 + $0x998] sm:$0xff]  ;;  %v2719_v47 = vpack.c.bf16 %v572_v41, %v556_v39  ;;  %v586_v49 = vld [vmem:[#allocation5 + $0x900] sm:$0xff] }
  0xb6   : > { %2708 = vmatpush1.bf16.msra.mxu1 %v2707_v11  ;;  %2630 = vmatprep.subr.bf16.mxu0 %v2629_v12  ;;  %v2641_v48 = vpack.c.bf16 %v603_v43, %v587_v42  ;;  %v602_v50 = vld [vmem:[#allocation5 + $0x980] sm:$0xff]  ;;  %v588_v51 = vld [vmem:[#allocation5 + $0x910] sm:$0xff]  ;;  %v2721_v52 = vpack.c.bf16 %v605_v45, %v589_v44  ;;  %v619_v54 = vld [vmem:[#allocation5 + $0xa08] sm:$0xff] }
  0xb7   : > { %2710 = vmatprep.subr.bf16.mxu1 %v2709_v16  ;;  %v604_v53 = vld [vmem:[#allocation5 + $0x990] sm:$0xff]  ;;  %v635_v55 = vld [vmem:[#allocation5 + $0xa88] sm:$0xff]  ;;  %v621_v56 = vld [vmem:[#allocation5 + $0xa18] sm:$0xff]  ;;  %v2643_v58 = vpack.c.bf16 %v602_v50, %v586_v49 }
  0xb8   : > { %v637_v57 = vld [vmem:[#allocation5 + $0xa98] sm:$0xff]  ;;  %v2723_v59 = vpack.c.bf16 %v604_v53, %v588_v51  ;;  %v2645_v60 = vpack.c.bf16 %v635_v55, %v619_v54  ;;  %v618_v61 = vld [vmem:[#allocation5 + $0xa00] sm:$0xff]  ;;  %v620_v63 = vld [vmem:[#allocation5 + $0xa10] sm:$0xff] }
  0xb9   : > { %2632 = vmatpush1.bf16.msra.mxu0 %v2631_v22  ;;  %v634_v62 = vld [vmem:[#allocation5 + $0xa80] sm:$0xff]  ;;  %v2725_v0 = vpack.c.bf16 %v637_v57, %v621_v56  ;;  %v636_v1 = vld [vmem:[#allocation5 + $0xa90] sm:$0xff]  ;;  %v651_v2 = vld [vmem:[#allocation5 + $0xb08] sm:$0xff] }
  0xba   : > { %2712 = vmatpush1.bf16.msra.mxu1 %v2711_v23  ;;  %2634 = vmatprep.subr.bf16.mxu0 %v2633_v24  ;;  %v667_v3 = vld [vmem:[#allocation5 + $0xb88] sm:$0xff]  ;;  %v653_v4 = vld [vmem:[#allocation5 + $0xb18] sm:$0xff]  ;;  %v2647_v6 = vpack.c.bf16 %v634_v62, %v618_v61  ;;  %v650_v7 = vld [vmem:[#allocation5 + $0xb00] sm:$0xff]  ;;  %v2727_v8 = vpack.c.bf16 %v636_v1, %v620_v63 }
  0xbb   : > { %2714 = vmatprep.subr.bf16.mxu1 %v2713_v28  ;;  %v669_v5 = vld [vmem:[#allocation5 + $0xb98] sm:$0xff]  ;;  %v2649_v9 = vpack.c.bf16 %v667_v3, %v651_v2  ;;  %v666_v10 = vld [vmem:[#allocation5 + $0xb80] sm:$0xff]  ;;  %v652_v11 = vld [vmem:[#allocation5 + $0xb10] sm:$0xff] }
  0xbc   : > { %v668_v12 = vld [vmem:[#allocation5 + $0xb90] sm:$0xff]  ;;  %v2729_v13 = vpack.c.bf16 %v669_v5, %v653_v4  ;;  %v683_v14 = vld [vmem:[#allocation5 + $0xc08] sm:$0xff]  ;;  %v685_v17 = vld [vmem:[#allocation5 + $0xc18] sm:$0xff]  ;;  %v2651_v19 = vpack.c.bf16 %v666_v10, %v650_v7 }
  0xbd   : > { %2636 = vmatpush1.bf16.msra.mxu0 %v2635_v34  ;;  %v699_v15 = vld [vmem:[#allocation5 + $0xc88] sm:$0xff]  ;;  %v3921_v16 = vld [vmem:[%s3906_s9 + $0x8] sm:$0xff]  ;;  %v2731_v20 = vpack.c.bf16 %v668_v12, %v652_v11  ;;  %v682_v22 = vld [vmem:[#allocation5 + $0xc00] sm:$0xff] }
  0xbe   : > { %2716 = vmatpush1.bf16.msra.mxu1 %v2715_v35  ;;  %2638 = vmatprep.subr.bf16.mxu0 %v2637_v36  ;;  %v701_v18 = vld [vmem:[#allocation5 + $0xc98] sm:$0xff]  ;;  %v2653_v21 = vpack.c.bf16 %v699_v15, %v683_v14  ;;  %v698_v23 = vld [vmem:[#allocation5 + $0xc80] sm:$0xff]  ;;  %v684_v24 = vld [vmem:[#allocation5 + $0xc10] sm:$0xff] }
  0xbf   : > { %2718 = vmatprep.subr.bf16.mxu1 %v2717_v40  ;;  %1090 = vmatprep.mubr.f32.mxu0 %v3921_v16  ;;  %v2733_v25 = vpack.c.bf16 %v701_v18, %v685_v17  ;;  %v700_v26 = vld [vmem:[#allocation5 + $0xc90] sm:$0xff]  ;;  %v715_v27 = vld [vmem:[#allocation5 + $0xd08] sm:$0xff]  ;;  %v717_v29 = vld [vmem:[#allocation5 + $0xd18] sm:$0xff]  ;;  %v2655_v31 = vpack.c.bf16 %v698_v23, %v682_v22 }
  0xc0   : > { %1232 = vmatprep.mubr.f32.mxu1 %v3921_v16  ;;  %v731_v28 = vld [vmem:[#allocation5 + $0xd88] sm:$0xff]  ;;  %v733_v30 = vld [vmem:[#allocation5 + $0xd98] sm:$0xff]  ;;  %v2735_v32 = vpack.c.bf16 %v700_v26, %v684_v24  ;;  %v714_v34 = vld [vmem:[#allocation5 + $0xd00] sm:$0xff] }
  0xc1   : > { %2640 = vmatpush1.bf16.msra.mxu0 %v2639_v46  ;;  %v2657_v33 = vpack.c.bf16 %v731_v28, %v715_v27  ;;  %v730_v35 = vld [vmem:[#allocation5 + $0xd80] sm:$0xff]  ;;  %v716_v36 = vld [vmem:[#allocation5 + $0xd10] sm:$0xff]  ;;  %v2737_v37 = vpack.c.bf16 %v733_v30, %v717_v29  ;;  %v747_v39 = vld [vmem:[#allocation5 + $0xe08] sm:$0xff] }
  0xc2   : > { %2720 = vmatpush1.bf16.msra.mxu1 %v2719_v47  ;;  %2642 = vmatprep.subr.bf16.mxu0 %v2641_v48  ;;  %v732_v38 = vld [vmem:[#allocation5 + $0xd90] sm:$0xff]  ;;  %v763_v40 = vld [vmem:[#allocation5 + $0xe88] sm:$0xff]  ;;  %v749_v41 = vld [vmem:[#allocation5 + $0xe18] sm:$0xff]  ;;  %v2659_v43 = vpack.c.bf16 %v730_v35, %v714_v34 }
  0xc3   : > { %2722 = vmatprep.subr.bf16.mxu1 %v2721_v52  ;;  %v765_v42 = vld [vmem:[#allocation5 + $0xe98] sm:$0xff]  ;;  %v2739_v44 = vpack.c.bf16 %v732_v38, %v716_v36  ;;  %v2661_v45 = vpack.c.bf16 %v763_v40, %v747_v39  ;;  %v746_v46 = vld [vmem:[#allocation5 + $0xe00] sm:$0xff]  ;;  %v748_v48 = vld [vmem:[#allocation5 + $0xe10] sm:$0xff]  ;;  %v3664_v39 = vmov 0.0  }
  0xc4   : > { %v762_v47 = vld [vmem:[#allocation5 + $0xe80] sm:$0xff]  ;;  %v2741_v49 = vpack.c.bf16 %v765_v42, %v749_v41  ;;  %v764_v50 = vld [vmem:[#allocation5 + $0xe90] sm:$0xff]  ;;  %v779_v51 = vld [vmem:[#allocation5 + $0xf08] sm:$0xff] }
  0xc5   : > { %2644 = vmatpush1.bf16.msra.mxu0 %v2643_v58  ;;  %v795_v52 = vld [vmem:[#allocation5 + $0xf88] sm:$0xff]  ;;  %v781_v53 = vld [vmem:[#allocation5 + $0xf18] sm:$0xff]  ;;  %v2663_v55 = vpack.c.bf16 %v762_v47, %v746_v46  ;;  %v2743_v56 = vpack.c.bf16 %v764_v50, %v748_v48  ;;  %v778_v58 = vld [vmem:[#allocation5 + $0xf00] sm:$0xff] }
  0xc6   : > { %2724 = vmatpush1.bf16.msra.mxu1 %v2723_v59  ;;  %2646 = vmatprep.subr.bf16.mxu0 %v2645_v60  ;;  %v797_v54 = vld [vmem:[#allocation5 + $0xf98] sm:$0xff]  ;;  %v2665_v57 = vpack.c.bf16 %v795_v52, %v779_v51  ;;  %v794_v59 = vld [vmem:[#allocation5 + $0xf80] sm:$0xff]  ;;  %v780_v60 = vld [vmem:[#allocation5 + $0xf10] sm:$0xff] }
  0xc7   : > { %2726 = vmatprep.subr.bf16.mxu1 %v2725_v0  ;;  %v2745_v61 = vpack.c.bf16 %v797_v54, %v781_v53  ;;  %v796_v62 = vld [vmem:[#allocation5 + $0xf90] sm:$0xff]  ;;  %v811_v63 = vld [vmem:[#allocation5 + $0x1008] sm:$0xff]  ;;  %v813_v1 = vld [vmem:[#allocation5 + $0x1018] sm:$0xff]  ;;  %v2667_v3 = vpack.c.bf16 %v794_v59, %v778_v58 }
  0xc8   : > { %v827_v0 = vld [vmem:[#allocation5 + $0x1088] sm:$0xff]  ;;  %v829_v2 = vld [vmem:[#allocation5 + $0x1098] sm:$0xff]  ;;  %v2747_v4 = vpack.c.bf16 %v796_v62, %v780_v60  ;;  %v826_v7 = vld [vmem:[#allocation5 + $0x1080] sm:$0xff] }
  0xc9   : > { %2648 = vmatpush1.bf16.msra.mxu0 %v2647_v6  ;;  %v2669_v5 = vpack.c.bf16 %v827_v0, %v811_v63  ;;  %v810_v6 = vld [vmem:[#allocation5 + $0x1000] sm:$0xff]  ;;  %v828_v10 = vld [vmem:[#allocation5 + $0x1090] sm:$0xff]  ;;  %v843_v11 = vld [vmem:[#allocation5 + $0x1108] sm:$0xff] }
  0xca   : > { %2728 = vmatpush1.bf16.msra.mxu1 %v2727_v8  ;;  %2650 = vmatprep.subr.bf16.mxu0 %v2649_v9  ;;  %v812_v8 = vld [vmem:[#allocation5 + $0x1010] sm:$0xff]  ;;  %v2749_v9 = vpack.c.bf16 %v829_v2, %v813_v1  ;;  %v859_v12 = vld [vmem:[#allocation5 + $0x1188] sm:$0xff]  ;;  %v861_v14 = vld [vmem:[#allocation5 + $0x1198] sm:$0xff]  ;;  %v2671_v17 = vpack.c.bf16 %v826_v7, %v810_v6 }
  0xcb   : > { %2730 = vmatprep.subr.bf16.mxu1 %v2729_v13  ;;  %v845_v13 = vld [vmem:[#allocation5 + $0x1118] sm:$0xff]  ;;  %v3926_v15 = vld [vmem:[%s3906_s9] sm:$0xff]  ;;  %v2751_v18 = vpack.c.bf16 %v828_v10, %v812_v8  ;;  %v922_v46 = vld [vmem:[#allocation5 + $0x1380] sm:$0xff] }
  0xcc   : > { %v844_v22 = vld [vmem:[#allocation5 + $0x1110] sm:$0xff]  ;;  %v2753_v23 = vpack.c.bf16 %v861_v14, %v845_v13  ;;  %v891_v26 = vld [vmem:[#allocation5 + $0x1288] sm:$0xff]  ;;  %v877_v27 = vld [vmem:[#allocation5 + $0x1218] sm:$0xff] }
  0xcd   : > { %2652 = vmatpush1.bf16.msra.mxu0 %v2651_v19  ;;  %v2673_v19 = vpack.c.bf16 %v859_v12, %v843_v11  ;;  %v860_v24 = vld [vmem:[#allocation5 + $0x1190] sm:$0xff]  ;;  %v893_v28 = vld [vmem:[#allocation5 + $0x1298] sm:$0xff]  ;;  %v923_v38 = vld [vmem:[#allocation5 + $0x1388] sm:$0xff] }
  0xce   : > { %2732 = vmatpush1.bf16.msra.mxu1 %v2731_v20  ;;  %2654 = vmatprep.subr.bf16.mxu0 %v2653_v21  ;;  %v842_v20 = vld [vmem:[#allocation5 + $0x1100] sm:$0xff]  ;;  %v2755_v30 = vpack.c.bf16 %v860_v24, %v844_v22  ;;  %v876_v34 = vld [vmem:[#allocation5 + $0x1210] sm:$0xff]  ;;  %v2757_v35 = vpack.c.bf16 %v893_v28, %v877_v27  ;;  %v909_v40 = vld [vmem:[#allocation5 + $0x1318] sm:$0xff] }
  0xcf   : > { %2734 = vmatprep.subr.bf16.mxu1 %v2733_v25  ;;  %v858_v21 = vld [vmem:[#allocation5 + $0x1180] sm:$0xff]  ;;  %v875_v25 = vld [vmem:[#allocation5 + $0x1208] sm:$0xff]  ;;  %v892_v36 = vld [vmem:[#allocation5 + $0x1290] sm:$0xff] }
  0xd0   : > { %v2675_v29 = vpack.c.bf16 %v858_v21, %v842_v20  ;;  %v925_v41 = vld [vmem:[#allocation5 + $0x1398] sm:$0xff]  ;;  %v908_v47 = vld [vmem:[#allocation5 + $0x1310] sm:$0xff]  ;;  %v303_v50 = vld [vmem:[#allocation5 + $0x28] sm:$0xff] }
  0xd1   : > { %2656 = vmatpush1.bf16.msra.mxu0 %v2655_v31  ;;  %v2677_v31 = vpack.c.bf16 %v891_v26, %v875_v25  ;;  %v2761_v48 = vpack.c.bf16 %v925_v41, %v909_v40  ;;  %v319_v51 = vld [vmem:[#allocation5 + $0xa8] sm:$0xff]  ;;  %v305_v52 = vld [vmem:[#allocation5 + $0x38] sm:$0xff]  ;;  %v318_v58 = vld [vmem:[#allocation5 + $0xa0] sm:$0xff] }
  0xd2   : > { %2736 = vmatpush1.bf16.msra.mxu1 %v2735_v32  ;;  %2658 = vmatprep.subr.bf16.mxu0 %v2657_v33  ;;  %v874_v32 = vld [vmem:[#allocation5 + $0x1200] sm:$0xff]  ;;  %v321_v53 = vld [vmem:[#allocation5 + $0xb8] sm:$0xff]  ;;  %v304_v59 = vld [vmem:[#allocation5 + $0x30] sm:$0xff] }
  0xd3   : > { %2738 = vmatprep.subr.bf16.mxu1 %v2737_v37  ;;  %v890_v33 = vld [vmem:[#allocation5 + $0x1280] sm:$0xff]  ;;  %v907_v37 = vld [vmem:[#allocation5 + $0x1308] sm:$0xff]  ;;  %v2845_v60 = vpack.c.bf16 %v321_v53, %v305_v52  ;;  %v337_v0 = vld [vmem:[#allocation5 + $0x138] sm:$0xff] }
  0xd4   : > { %v2679_v42 = vpack.c.bf16 %v890_v33, %v874_v32  ;;  %v335_v62 = vld [vmem:[#allocation5 + $0x128] sm:$0xff]  ;;  %v353_v1 = vld [vmem:[#allocation5 + $0x1b8] sm:$0xff]  ;;  %v334_v6 = vld [vmem:[#allocation5 + $0x120] sm:$0xff] }
  0xd5   : > { %2660 = vmatpush1.bf16.msra.mxu0 %v2659_v43  ;;  %v2759_v43 = vpack.c.bf16 %v892_v36, %v876_v34  ;;  %v351_v63 = vld [vmem:[#allocation5 + $0x1a8] sm:$0xff]  ;;  %v3933_v2 = vld [vmem:[%s3906_s9 + $0x10] sm:$0xff]  ;;  %v336_v8 = vld [vmem:[#allocation5 + $0x130] sm:$0xff] }
  0xd6   : > { %2740 = vmatpush1.bf16.msra.mxu1 %v2739_v44  ;;  %2662 = vmatprep.subr.bf16.mxu0 %v2661_v45  ;;  %v2681_v44 = vpack.c.bf16 %v923_v38, %v907_v37  ;;  %v906_v45 = vld [vmem:[#allocation5 + $0x1300] sm:$0xff]  ;;  %v352_v10 = vld [vmem:[#allocation5 + $0x1b0] sm:$0xff]  ;;  %v367_v11 = vld [vmem:[#allocation5 + $0x228] sm:$0xff] }
  0xd7   : > { %2742 = vmatprep.subr.bf16.mxu1 %v2741_v49  ;;  %v924_v49 = vld [vmem:[#allocation5 + $0x1390] sm:$0xff]  ;;  %v2683_v54 = vpack.c.bf16 %v922_v46, %v906_v45  ;;  %v350_v7 = vld [vmem:[#allocation5 + $0x1a0] sm:$0xff]  ;;  %v383_v12 = vld [vmem:[#allocation5 + $0x2a8] sm:$0xff] }
  0xd8   : > { %v369_v13 = vld [vmem:[#allocation5 + $0x238] sm:$0xff]  ;;  %v366_v20 = vld [vmem:[#allocation5 + $0x220] sm:$0xff]  ;;  %v368_v22 = vld [vmem:[#allocation5 + $0x230] sm:$0xff] }
  0xd9   : > { %2664 = vmatpush1.bf16.msra.mxu0 %v2663_v55  ;;  %v2763_v55 = vpack.c.bf16 %v924_v49, %v908_v47  ;;  %v385_v14 = vld [vmem:[#allocation5 + $0x2b8] sm:$0xff]  ;;  %v382_v21 = vld [vmem:[#allocation5 + $0x2a0] sm:$0xff]  ;;  %v384_v24 = vld [vmem:[#allocation5 + $0x2b0] sm:$0xff] }
  0xda   : > { %2744 = vmatpush1.bf16.msra.mxu1 %v2743_v56  ;;  %2666 = vmatprep.subr.bf16.mxu0 %v2665_v57  ;;  %v2765_v56 = vpack.c.bf16 %v319_v51, %v303_v50  ;;  %v302_v57 = vld [vmem:[#allocation5 + $0x20] sm:$0xff]  ;;  %v399_v25 = vld [vmem:[#allocation5 + $0x328] sm:$0xff]  ;;  %v401_v27 = vld [vmem:[#allocation5 + $0x338] sm:$0xff] }
  0xdb   : > { %2746 = vmatprep.subr.bf16.mxu1 %v2745_v61  ;;  %v320_v61 = vld [vmem:[#allocation5 + $0xb0] sm:$0xff]  ;;  %v415_v26 = vld [vmem:[#allocation5 + $0x3a8] sm:$0xff]  ;;  %v417_v28 = vld [vmem:[#allocation5 + $0x3b8] sm:$0xff] }
  0xdc   : > { %v398_v32 = vld [vmem:[#allocation5 + $0x320] sm:$0xff]  ;;  %v400_v34 = vld [vmem:[#allocation5 + $0x330] sm:$0xff]  ;;  %v431_v37 = vld [vmem:[#allocation5 + $0x428] sm:$0xff] }
  0xdd   : > { %2668 = vmatpush1.bf16.msra.mxu0 %v2667_v3  ;;  %v2767_v3 = vpack.c.bf16 %v318_v58, %v302_v57  ;;  %v414_v33 = vld [vmem:[#allocation5 + $0x3a0] sm:$0xff]  ;;  %v416_v36 = vld [vmem:[#allocation5 + $0x3b0] sm:$0xff]  ;;  %v447_v38 = vld [vmem:[#allocation5 + $0x4a8] sm:$0xff] }
  0xde   : > { %2748 = vmatpush1.bf16.msra.mxu1 %v2747_v4  ;;  %2670 = vmatprep.subr.bf16.mxu0 %v2669_v5  ;;  %v2847_v4 = vpack.c.bf16 %v320_v61, %v304_v59  ;;  %v2769_v5 = vpack.c.bf16 %v351_v63, %v335_v62  ;;  %v433_v40 = vld [vmem:[#allocation5 + $0x438] sm:$0xff]  ;;  %v446_v45 = vld [vmem:[#allocation5 + $0x4a0] sm:$0xff]  ;;  %v432_v46 = vld [vmem:[#allocation5 + $0x430] sm:$0xff] }
  0xdf   : > { %2750 = vmatprep.subr.bf16.mxu1 %v2749_v9  ;;  %v2849_v9 = vpack.c.bf16 %v353_v1, %v337_v0  ;;  %v449_v41 = vld [vmem:[#allocation5 + $0x4b8] sm:$0xff]  ;;  %v463_v49 = vld [vmem:[#allocation5 + $0x528] sm:$0xff]  ;;  %v478_v57 = vld [vmem:[#allocation5 + $0x5a0] sm:$0xff] }
  0xe0   : > { %1091 = vmatmul.mubr.f32.vlgmr.msra.gmra.mrb[0].mxu0 %v3926_v15  ;;  %v2861_v47 = vpack.c.bf16 %v449_v41, %v433_v40  ;;  %v479_v50 = vld [vmem:[#allocation5 + $0x5a8] sm:$0xff]  ;;  %v465_v51 = vld [vmem:[#allocation5 + $0x538] sm:$0xff]  ;;  %v464_v58 = vld [vmem:[#allocation5 + $0x530] sm:$0xff] }
  0xe1   : > { %2672 = vmatpush1.bf16.msra.mxu0 %v2671_v17  ;;  %1233 = vmatmul.mubr.f32.vlgmr.msra.gmra.mrb[0].mxu1 %v3926_v15  ;;  %v2771_v17 = vpack.c.bf16 %v350_v7, %v334_v6  ;;  %v481_v52 = vld [vmem:[#allocation5 + $0x5b8] sm:$0xff]  ;;  %v495_v61 = vld [vmem:[#allocation5 + $0x628] sm:$0xff]  ;;  %v510_v6 = vld [vmem:[#allocation5 + $0x6a0] sm:$0xff] }
  0xe2   : > { %2752 = vmatpush1.bf16.msra.mxu1 %v2751_v18  ;;  %2674 = vmatprep.subr.bf16.mxu0 %v2673_v19  ;;  %v2851_v18 = vpack.c.bf16 %v352_v10, %v336_v8  ;;  %v2773_v19 = vpack.c.bf16 %v383_v12, %v367_v11  ;;  %v2865_v59 = vpack.c.bf16 %v481_v52, %v465_v51  ;;  %v511_v62 = vld [vmem:[#allocation5 + $0x6a8] sm:$0xff]  ;;  %v497_v63 = vld [vmem:[#allocation5 + $0x638] sm:$0xff]  ;;  %v496_v7 = vld [vmem:[#allocation5 + $0x630] sm:$0xff] }
  0xe3   : > { %2754 = vmatprep.subr.bf16.mxu1 %v2753_v23  ;;  %1161 = vmatprep.mubr.f32.mxu0 %v3664_v39  ;;  %v2853_v23 = vpack.c.bf16 %v385_v14, %v369_v13  ;;  %v513_v0 = vld [vmem:[#allocation5 + $0x6b8] sm:$0xff]  ;;  %v527_v10 = vld [vmem:[#allocation5 + $0x728] sm:$0xff] }
  0xe4   : > { %1303 = vmatprep.mubr.f32.mxu1 %v3664_v39  ;;  %v2869_v8 = vpack.c.bf16 %v513_v0, %v497_v63  ;;  %v543_v11 = vld [vmem:[#allocation5 + $0x7a8] sm:$0xff]  ;;  %v529_v12 = vld [vmem:[#allocation5 + $0x738] sm:$0xff] }
  0xe5   : > { %2676 = vmatpush1.bf16.msra.mxu0 %v2675_v29  ;;  %v2775_v29 = vpack.c.bf16 %v382_v21, %v366_v20  ;;  %v545_v13 = vld [vmem:[#allocation5 + $0x7b8] sm:$0xff]  ;;  %v542_v20 = vld [vmem:[#allocation5 + $0x7a0] sm:$0xff]  ;;  %v528_v21 = vld [vmem:[#allocation5 + $0x730] sm:$0xff] }
  0xe6   : > { %2756 = vmatpush1.bf16.msra.mxu1 %v2755_v30  ;;  %2678 = vmatprep.subr.bf16.mxu0 %v2677_v31  ;;  %v2855_v30 = vpack.c.bf16 %v384_v24, %v368_v22  ;;  %v2777_v31 = vpack.c.bf16 %v415_v26, %v399_v25  ;;  %v2873_v22 = vpack.c.bf16 %v545_v13, %v529_v12  ;;  %v559_v24 = vld [vmem:[#allocation5 + $0x828] sm:$0xff]  ;;  %v561_v26 = vld [vmem:[#allocation5 + $0x838] sm:$0xff] }
  0xe7   : > { %2758 = vmatprep.subr.bf16.mxu1 %v2757_v35  ;;  %v2857_v35 = vpack.c.bf16 %v417_v28, %v401_v27  ;;  %v575_v25 = vld [vmem:[#allocation5 + $0x8a8] sm:$0xff]  ;;  %v577_v27 = vld [vmem:[#allocation5 + $0x8b8] sm:$0xff] }
  0xe8   : > { %v609_v40 = vld [vmem:[#allocation5 + $0x9b8] sm:$0xff] }
  0xe9   : > { %2680 = vmatpush1.bf16.msra.mxu0 %v2679_v42  ;;  %v2779_v42 = vpack.c.bf16 %v414_v33, %v398_v32  ;;  %v574_v32 = vld [vmem:[#allocation5 + $0x8a0] sm:$0xff]  ;;  %v560_v33 = vld [vmem:[#allocation5 + $0x830] sm:$0xff]  ;;  %v641_v51 = vld [vmem:[#allocation5 + $0xab8] sm:$0xff] }
  0xea   : > { %2760 = vmatpush1.bf16.msra.mxu1 %v2759_v43  ;;  %2682 = vmatprep.subr.bf16.mxu0 %v2681_v44  ;;  %v2781_v43 = vpack.c.bf16 %v447_v38, %v431_v37  ;;  %v430_v44 = vld [vmem:[#allocation5 + $0x420] sm:$0xff]  ;;  %v607_v37 = vld [vmem:[#allocation5 + $0x9a8] sm:$0xff]  ;;  %v593_v38 = vld [vmem:[#allocation5 + $0x938] sm:$0xff] }
  0xeb   : > { %2762 = vmatprep.subr.bf16.mxu1 %v2761_v48  ;;  %v448_v48 = vld [vmem:[#allocation5 + $0x4b0] sm:$0xff]  ;;  %v2783_v53 = vpack.c.bf16 %v446_v45, %v430_v44  ;;  %v606_v44 = vld [vmem:[#allocation5 + $0x9a0] sm:$0xff]  ;;  %v673_v63 = vld [vmem:[#allocation5 + $0xbb8] sm:$0xff] }
  0xec   : > { %v592_v45 = vld [vmem:[#allocation5 + $0x930] sm:$0xff]  ;;  %v705_v12 = vld [vmem:[#allocation5 + $0xcb8] sm:$0xff] }
  0xed   : > { %2684 = vmatpush1.bf16.msra.mxu0 %v2683_v54  ;;  %v2863_v54 = vpack.c.bf16 %v448_v48, %v432_v46  ;;  %v2881_v46 = vpack.c.bf16 %v609_v40, %v593_v38  ;;  %v623_v48 = vld [vmem:[#allocation5 + $0xa28] sm:$0xff]  ;;  %v769_v38 = vld [vmem:[#allocation5 + $0xeb8] sm:$0xff] }
  0xee   : > { %2764 = vmatpush1.bf16.msra.mxu1 %v2763_v55  ;;  %2766 = vmatprep.subr.bf16.mxu0 %v2765_v56  ;;  %v2785_v55 = vpack.c.bf16 %v479_v50, %v463_v49  ;;  %v462_v56 = vld [vmem:[#allocation5 + $0x520] sm:$0xff]  ;;  %v639_v49 = vld [vmem:[#allocation5 + $0xaa8] sm:$0xff]  ;;  %v625_v50 = vld [vmem:[#allocation5 + $0xa38] sm:$0xff] }
  0xef   : > { %2846 = vmatprep.subr.bf16.mxu1 %v2845_v60  ;;  %v480_v60 = vld [vmem:[#allocation5 + $0x5b0] sm:$0xff]  ;;  %v2787_v1 = vpack.c.bf16 %v478_v57, %v462_v56  ;;  %v638_v56 = vld [vmem:[#allocation5 + $0xaa0] sm:$0xff] }
  0xf0   : > { %2522 = vmatmul.mubr.msk.f32.vlgmr.msra.gmra.mrb[0].mxu0 %vm1022_vm0, %v3933_v2  ;;  %v624_v57 = vld [vmem:[#allocation5 + $0xa30] sm:$0xff] }
  0xf1   : > { %2523 = vmatmul.mubr.msk.f32.vlgmr.msra.gmra.mrb[0].mxu1 %vm1022_vm0, %v3933_v2  ;;  %2768 = vmatpush1.bf16.msra.mxu0 %v2767_v3  ;;  %v2867_v3 = vpack.c.bf16 %v480_v60, %v464_v58  ;;  %v2885_v58 = vpack.c.bf16 %v641_v51, %v625_v50  ;;  %v655_v60 = vld [vmem:[#allocation5 + $0xb28] sm:$0xff]  ;;  %v801_v50 = vld [vmem:[#allocation5 + $0xfb8] sm:$0xff] }
  0xf2   : > { %2848 = vmatpush1.bf16.msra.mxu1 %v2847_v4  ;;  %2770 = vmatprep.subr.bf16.mxu0 %v2769_v5  ;;  %v2789_v4 = vpack.c.bf16 %v511_v62, %v495_v61  ;;  %v494_v5 = vld [vmem:[#allocation5 + $0x620] sm:$0xff]  ;;  %v671_v61 = vld [vmem:[#allocation5 + $0xba8] sm:$0xff]  ;;  %v657_v62 = vld [vmem:[#allocation5 + $0xb38] sm:$0xff] }
  0xf3   : > { %2850 = vmatprep.subr.bf16.mxu1 %v2849_v9  ;;  %1374 = vmatprep.mubr.f32.mxu0 %v3921_v16  ;;  %v512_v9 = vld [vmem:[#allocation5 + $0x6b0] sm:$0xff]  ;;  %v2791_v14 = vpack.c.bf16 %v510_v6, %v494_v5  ;;  %v670_v5 = vld [vmem:[#allocation5 + $0xba0] sm:$0xff] }
  0xf4   : > { %1516 = vmatprep.mubr.f32.mxu1 %v3921_v16  ;;  %v2859_v16 = vpack.c.bf16 %v416_v36, %v400_v34  ;;  %v2877_v34 = vpack.c.bf16 %v577_v27, %v561_v26  ;;  %v591_v36 = vld [vmem:[#allocation5 + $0x928] sm:$0xff]  ;;  %v656_v6 = vld [vmem:[#allocation5 + $0xb30] sm:$0xff]  ;;  %v737_v26 = vld [vmem:[#allocation5 + $0xdb8] sm:$0xff] }
  0xf5   : > { %2772 = vmatpush1.bf16.msra.mxu0 %v2771_v17  ;;  %v2871_v17 = vpack.c.bf16 %v512_v9, %v496_v7  ;;  %v2889_v7 = vpack.c.bf16 %v673_v63, %v657_v62  ;;  %v687_v9 = vld [vmem:[#allocation5 + $0xc28] sm:$0xff]  ;;  %v833_v62 = vld [vmem:[#allocation5 + $0x10b8] sm:$0xff] }
  0xf6   : > { %2852 = vmatpush1.bf16.msra.mxu1 %v2851_v18  ;;  %2774 = vmatprep.subr.bf16.mxu0 %v2773_v19  ;;  %v2793_v18 = vpack.c.bf16 %v543_v11, %v527_v10  ;;  %v526_v19 = vld [vmem:[#allocation5 + $0x720] sm:$0xff]  ;;  %v703_v10 = vld [vmem:[#allocation5 + $0xca8] sm:$0xff]  ;;  %v689_v11 = vld [vmem:[#allocation5 + $0xc38] sm:$0xff] }
  0xf7   : > { %2854 = vmatprep.subr.bf16.mxu1 %v2853_v23  ;;  %v544_v23 = vld [vmem:[#allocation5 + $0x7b0] sm:$0xff]  ;;  %v2795_v28 = vpack.c.bf16 %v542_v20, %v526_v19  ;;  %v702_v19 = vld [vmem:[#allocation5 + $0xca0] sm:$0xff] }
  0xf8   : > { %v688_v20 = vld [vmem:[#allocation5 + $0xc30] sm:$0xff] }
  0xf9   : > { %2776 = vmatpush1.bf16.msra.mxu0 %v2775_v29  ;;  %v2875_v29 = vpack.c.bf16 %v544_v23, %v528_v21  ;;  %v2893_v21 = vpack.c.bf16 %v705_v12, %v689_v11  ;;  %v719_v23 = vld [vmem:[#allocation5 + $0xd28] sm:$0xff]  ;;  %v865_v11 = vld [vmem:[#allocation5 + $0x11b8] sm:$0xff] }
  0xfa   : > { %2856 = vmatpush1.bf16.msra.mxu1 %v2855_v30  ;;  %2778 = vmatprep.subr.bf16.mxu0 %v2777_v31  ;;  %v2797_v30 = vpack.c.bf16 %v575_v25, %v559_v24  ;;  %v558_v31 = vld [vmem:[#allocation5 + $0x820] sm:$0xff]  ;;  %v735_v24 = vld [vmem:[#allocation5 + $0xda8] sm:$0xff]  ;;  %v721_v25 = vld [vmem:[#allocation5 + $0xd38] sm:$0xff] }
  0xfb   : > { %2858 = vmatprep.subr.bf16.mxu1 %v2857_v35  ;;  %v576_v35 = vld [vmem:[#allocation5 + $0x8b0] sm:$0xff]  ;;  %v2799_v41 = vpack.c.bf16 %v574_v32, %v558_v31  ;;  %v734_v31 = vld [vmem:[#allocation5 + $0xda0] sm:$0xff] }
  0xfc   : > { %v720_v32 = vld [vmem:[#allocation5 + $0xd30] sm:$0xff] }
  0xfd   : > { %2780 = vmatpush1.bf16.msra.mxu0 %v2779_v42  ;;  %v2879_v42 = vpack.c.bf16 %v576_v35, %v560_v33  ;;  %v2897_v33 = vpack.c.bf16 %v737_v26, %v721_v25  ;;  %v751_v35 = vld [vmem:[#allocation5 + $0xe28] sm:$0xff]  ;;  %v897_v25 = vld [vmem:[#allocation5 + $0x12b8] sm:$0xff] }
  0xfe   : > { %2860 = vmatpush1.bf16.msra.mxu1 %v2859_v16  ;;  %2782 = vmatprep.subr.bf16.mxu0 %v2781_v43  ;;  %v2801_v16 = vpack.c.bf16 %v607_v37, %v591_v36  ;;  %v590_v43 = vld [vmem:[#allocation5 + $0x920] sm:$0xff]  ;;  %v767_v36 = vld [vmem:[#allocation5 + $0xea8] sm:$0xff]  ;;  %v753_v37 = vld [vmem:[#allocation5 + $0xe38] sm:$0xff] }
  0xff   : > { %2862 = vmatprep.subr.bf16.mxu1 %v2861_v47  ;;  %v608_v47 = vld [vmem:[#allocation5 + $0x9b0] sm:$0xff]  ;;  %v2803_v52 = vpack.c.bf16 %v606_v44, %v590_v43  ;;  %v766_v43 = vld [vmem:[#allocation5 + $0xea0] sm:$0xff] }
 0x100   : > { %v752_v44 = vld [vmem:[#allocation5 + $0xe30] sm:$0xff] }
 0x101   : > { %2784 = vmatpush1.bf16.msra.mxu0 %v2783_v53  ;;  %v2883_v53 = vpack.c.bf16 %v608_v47, %v592_v45  ;;  %v2901_v45 = vpack.c.bf16 %v769_v38, %v753_v37  ;;  %v783_v47 = vld [vmem:[#allocation5 + $0xf28] sm:$0xff]  ;;  %v929_v37 = vld [vmem:[#allocation5 + $0x13b8] sm:$0xff] }
 0x102   : > { %2864 = vmatpush1.bf16.msra.mxu1 %v2863_v54  ;;  %2786 = vmatprep.subr.bf16.mxu0 %v2785_v55  ;;  %v2805_v54 = vpack.c.bf16 %v639_v49, %v623_v48  ;;  %v622_v55 = vld [vmem:[#allocation5 + $0xa20] sm:$0xff]  ;;  %v799_v48 = vld [vmem:[#allocation5 + $0xfa8] sm:$0xff]  ;;  %v785_v49 = vld [vmem:[#allocation5 + $0xf38] sm:$0xff] }
 0x103   : > { %2866 = vmatprep.subr.bf16.mxu1 %v2865_v59  ;;  %v640_v59 = vld [vmem:[#allocation5 + $0xab0] sm:$0xff]  ;;  %v2807_v0 = vpack.c.bf16 %v638_v56, %v622_v55  ;;  %v798_v55 = vld [vmem:[#allocation5 + $0xfa0] sm:$0xff] }
 0x104   : > { %v784_v56 = vld [vmem:[#allocation5 + $0xf30] sm:$0xff] }
 0x105   : > { %2788 = vmatpush1.bf16.msra.mxu0 %v2787_v1  ;;  %v2887_v1 = vpack.c.bf16 %v640_v59, %v624_v57  ;;  %v2905_v57 = vpack.c.bf16 %v801_v50, %v785_v49  ;;  %v815_v59 = vld [vmem:[#allocation5 + $0x1028] sm:$0xff] }
 0x106   : > { %2868 = vmatpush1.bf16.msra.mxu1 %v2867_v3  ;;  %2790 = vmatprep.subr.bf16.mxu0 %v2789_v4  ;;  %v2809_v3 = vpack.c.bf16 %v671_v61, %v655_v60  ;;  %v654_v4 = vld [vmem:[#allocation5 + $0xb20] sm:$0xff]  ;;  %v831_v60 = vld [vmem:[#allocation5 + $0x10a8] sm:$0xff]  ;;  %v817_v61 = vld [vmem:[#allocation5 + $0x1038] sm:$0xff] }
 0x107   : > { %2870 = vmatprep.subr.bf16.mxu1 %v2869_v8  ;;  %v672_v8 = vld [vmem:[#allocation5 + $0xbb0] sm:$0xff]  ;;  %v2811_v13 = vpack.c.bf16 %v670_v5, %v654_v4  ;;  %v830_v4 = vld [vmem:[#allocation5 + $0x10a0] sm:$0xff] }
 0x108   : > { %v816_v5 = vld [vmem:[#allocation5 + $0x1030] sm:$0xff] }
 0x109   : > { %2792 = vmatpush1.bf16.msra.mxu0 %v2791_v14  ;;  %v2891_v14 = vpack.c.bf16 %v672_v8, %v656_v6  ;;  %v2909_v6 = vpack.c.bf16 %v833_v62, %v817_v61  ;;  %v847_v8 = vld [vmem:[#allocation5 + $0x1128] sm:$0xff] }
 0x10a   : > { %2872 = vmatpush1.bf16.msra.mxu1 %v2871_v17  ;;  %2794 = vmatprep.subr.bf16.mxu0 %v2793_v18  ;;  %v2813_v17 = vpack.c.bf16 %v703_v10, %v687_v9  ;;  %v686_v18 = vld [vmem:[#allocation5 + $0xc20] sm:$0xff]  ;;  %v863_v9 = vld [vmem:[#allocation5 + $0x11a8] sm:$0xff]  ;;  %v849_v10 = vld [vmem:[#allocation5 + $0x1138] sm:$0xff] }
 0x10b   : > { %2874 = vmatprep.subr.bf16.mxu1 %v2873_v22  ;;  %v704_v22 = vld [vmem:[#allocation5 + $0xcb0] sm:$0xff]  ;;  %v2815_v27 = vpack.c.bf16 %v702_v19, %v686_v18  ;;  %v862_v18 = vld [vmem:[#allocation5 + $0x11a0] sm:$0xff] }
 0x10c   : > { %v848_v19 = vld [vmem:[#allocation5 + $0x1130] sm:$0xff] }
 0x10d   : > { %2796 = vmatpush1.bf16.msra.mxu0 %v2795_v28  ;;  %v2895_v28 = vpack.c.bf16 %v704_v22, %v688_v20  ;;  %v2913_v20 = vpack.c.bf16 %v865_v11, %v849_v10  ;;  %v879_v22 = vld [vmem:[#allocation5 + $0x1228] sm:$0xff] }
 0x10e   : > { %2876 = vmatpush1.bf16.msra.mxu1 %v2875_v29  ;;  %2798 = vmatprep.subr.bf16.mxu0 %v2797_v30  ;;  %v2817_v29 = vpack.c.bf16 %v735_v24, %v719_v23  ;;  %v718_v30 = vld [vmem:[#allocation5 + $0xd20] sm:$0xff]  ;;  %v895_v23 = vld [vmem:[#allocation5 + $0x12a8] sm:$0xff]  ;;  %v881_v24 = vld [vmem:[#allocation5 + $0x1238] sm:$0xff] }
 0x10f   : > { %2878 = vmatprep.subr.bf16.mxu1 %v2877_v34  ;;  %v736_v34 = vld [vmem:[#allocation5 + $0xdb0] sm:$0xff]  ;;  %v2819_v40 = vpack.c.bf16 %v734_v31, %v718_v30  ;;  %v894_v30 = vld [vmem:[#allocation5 + $0x12a0] sm:$0xff] }
 0x110   : > { %v880_v31 = vld [vmem:[#allocation5 + $0x1230] sm:$0xff] }
 0x111   : > { %2800 = vmatpush1.bf16.msra.mxu0 %v2799_v41  ;;  %v2899_v41 = vpack.c.bf16 %v736_v34, %v720_v32  ;;  %v2917_v32 = vpack.c.bf16 %v897_v25, %v881_v24  ;;  %v911_v34 = vld [vmem:[#allocation5 + $0x1328] sm:$0xff] }
 0x112   : > { %2880 = vmatpush1.bf16.msra.mxu1 %v2879_v42  ;;  %2802 = vmatprep.subr.bf16.mxu0 %v2801_v16  ;;  %v2821_v42 = vpack.c.bf16 %v767_v36, %v751_v35  ;;  %v750_v16 = vld [vmem:[#allocation5 + $0xe20] sm:$0xff]  ;;  %v927_v35 = vld [vmem:[#allocation5 + $0x13a8] sm:$0xff]  ;;  %v913_v36 = vld [vmem:[#allocation5 + $0x1338] sm:$0xff] }
 0x113   : > { %2882 = vmatprep.subr.bf16.mxu1 %v2881_v46  ;;  %v768_v46 = vld [vmem:[#allocation5 + $0xeb0] sm:$0xff]  ;;  %v2823_v51 = vpack.c.bf16 %v766_v43, %v750_v16  ;;  %v2921_v43 = vpack.c.bf16 %v929_v37, %v913_v36 }
 0x114   : > { %v912_v16 = vld [vmem:[#allocation5 + $0x1330] sm:$0xff] }
 0x115   : > { %2804 = vmatpush1.bf16.msra.mxu0 %v2803_v52  ;;  %v2903_v52 = vpack.c.bf16 %v768_v46, %v752_v44  ;;  %v928_v44 = vld [vmem:[#allocation5 + $0x13b0] sm:$0xff]  ;;  %v323_v46 = vld [vmem:[#allocation5 + $0xc8] sm:$0xff] }
 0x116   : > { %2884 = vmatpush1.bf16.msra.mxu1 %v2883_v53  ;;  %2806 = vmatprep.subr.bf16.mxu0 %v2805_v54  ;;  %v2825_v53 = vpack.c.bf16 %v799_v48, %v783_v47  ;;  %v782_v54 = vld [vmem:[#allocation5 + $0xf20] sm:$0xff]  ;;  %v309_v47 = vld [vmem:[#allocation5 + $0x58] sm:$0xff]  ;;  %v2923_v50 = vpack.c.bf16 %v928_v44, %v912_v16  ;;  %v452_v16 = vld [vmem:[#allocation5 + $0x4d0] sm:$0xff] }
 0x117   : > { %2886 = vmatprep.subr.bf16.mxu1 %v2885_v58  ;;  %v800_v58 = vld [vmem:[#allocation5 + $0xfb0] sm:$0xff]  ;;  %v2827_v63 = vpack.c.bf16 %v798_v55, %v782_v54  ;;  %v325_v48 = vld [vmem:[#allocation5 + $0xd8] sm:$0xff]  ;;  %v483_v44 = vld [vmem:[#allocation5 + $0x5c8] sm:$0xff] }
 0x118   : > { %v308_v54 = vld [vmem:[#allocation5 + $0x50] sm:$0xff]  ;;  %v3005_v55 = vpack.c.bf16 %v325_v48, %v309_v47 }
 0x119   : > { %2808 = vmatpush1.bf16.msra.mxu0 %v2807_v0  ;;  %v2907_v0 = vpack.c.bf16 %v800_v58, %v784_v56  ;;  %v324_v56 = vld [vmem:[#allocation5 + $0xd0] sm:$0xff]  ;;  %v355_v58 = vld [vmem:[#allocation5 + $0x1c8] sm:$0xff] }
 0x11a   : > { %2888 = vmatpush1.bf16.msra.mxu1 %v2887_v1  ;;  %2810 = vmatprep.subr.bf16.mxu0 %v2809_v3  ;;  %v2829_v1 = vpack.c.bf16 %v831_v60, %v815_v59  ;;  %v814_v3 = vld [vmem:[#allocation5 + $0x1020] sm:$0xff]  ;;  %v341_v59 = vld [vmem:[#allocation5 + $0x158] sm:$0xff]  ;;  %v3007_v62 = vpack.c.bf16 %v324_v56, %v308_v54  ;;  %v484_v54 = vld [vmem:[#allocation5 + $0x5d0] sm:$0xff] }
 0x11b   : > { %2890 = vmatprep.subr.bf16.mxu1 %v2889_v7  ;;  %v832_v7 = vld [vmem:[#allocation5 + $0x10b0] sm:$0xff]  ;;  %v2831_v12 = vpack.c.bf16 %v830_v4, %v814_v3  ;;  %v357_v60 = vld [vmem:[#allocation5 + $0x1d8] sm:$0xff]  ;;  %v515_v56 = vld [vmem:[#allocation5 + $0x6c8] sm:$0xff] }
 0x11c   : > { %v340_v3 = vld [vmem:[#allocation5 + $0x150] sm:$0xff]  ;;  %v3009_v4 = vpack.c.bf16 %v357_v60, %v341_v59 }
 0x11d   : > { %2812 = vmatpush1.bf16.msra.mxu0 %v2811_v13  ;;  %v2911_v13 = vpack.c.bf16 %v832_v7, %v816_v5  ;;  %v356_v5 = vld [vmem:[#allocation5 + $0x1d0] sm:$0xff]  ;;  %v387_v7 = vld [vmem:[#allocation5 + $0x2c8] sm:$0xff] }
 0x11e   : > { %2892 = vmatpush1.bf16.msra.mxu1 %v2891_v14  ;;  %2814 = vmatprep.subr.bf16.mxu0 %v2813_v17  ;;  %v2833_v14 = vpack.c.bf16 %v863_v9, %v847_v8  ;;  %v846_v17 = vld [vmem:[#allocation5 + $0x1120] sm:$0xff]  ;;  %v373_v8 = vld [vmem:[#allocation5 + $0x258] sm:$0xff]  ;;  %v3011_v11 = vpack.c.bf16 %v356_v5, %v340_v3  ;;  %v516_v3 = vld [vmem:[#allocation5 + $0x6d0] sm:$0xff] }
 0x11f   : > { %2894 = vmatprep.subr.bf16.mxu1 %v2893_v21  ;;  %v864_v21 = vld [vmem:[#allocation5 + $0x11b0] sm:$0xff]  ;;  %v2835_v26 = vpack.c.bf16 %v862_v18, %v846_v17  ;;  %v389_v9 = vld [vmem:[#allocation5 + $0x2d8] sm:$0xff]  ;;  %v547_v5 = vld [vmem:[#allocation5 + $0x7c8] sm:$0xff] }
 0x120   : > { %v372_v17 = vld [vmem:[#allocation5 + $0x250] sm:$0xff]  ;;  %v3013_v18 = vpack.c.bf16 %v389_v9, %v373_v8 }
 0x121   : > { %2816 = vmatpush1.bf16.msra.mxu0 %v2815_v27  ;;  %v2915_v27 = vpack.c.bf16 %v864_v21, %v848_v19  ;;  %v388_v19 = vld [vmem:[#allocation5 + $0x2d0] sm:$0xff]  ;;  %v419_v21 = vld [vmem:[#allocation5 + $0x3c8] sm:$0xff] }
 0x122   : > { %2896 = vmatpush1.bf16.msra.mxu1 %v2895_v28  ;;  %2818 = vmatprep.subr.bf16.mxu0 %v2817_v29  ;;  %v2837_v28 = vpack.c.bf16 %v895_v23, %v879_v22  ;;  %v878_v29 = vld [vmem:[#allocation5 + $0x1220] sm:$0xff]  ;;  %v3950_v22 = vld [vmem:[%s3906_s9 + $0x8] sm:$0xff]  ;;  %v3015_v25 = vpack.c.bf16 %v388_v19, %v372_v17  ;;  %v579_v19 = vld [vmem:[#allocation5 + $0x8c8] sm:$0xff] }
 0x123   : > { %2898 = vmatprep.subr.bf16.mxu1 %v2897_v33  ;;  %v896_v33 = vld [vmem:[#allocation5 + $0x12b0] sm:$0xff]  ;;  %v405_v23 = vld [vmem:[#allocation5 + $0x358] sm:$0xff] }
 0x124   : > { %v2919_v38 = vpack.c.bf16 %v896_v33, %v880_v31  ;;  %v420_v31 = vld [vmem:[#allocation5 + $0x3d0] sm:$0xff]  ;;  %v451_v33 = vld [vmem:[#allocation5 + $0x4c8] sm:$0xff] }
 0x125   : > { %2820 = vmatpush1.bf16.msra.mxu0 %v2819_v40  ;;  %v2841_v40 = vpack.c.bf16 %v927_v35, %v911_v34  ;;  %v437_v34 = vld [vmem:[#allocation5 + $0x458] sm:$0xff]  ;;  %v548_v17 = vld [vmem:[#allocation5 + $0x7d0] sm:$0xff] }
 0x126   : > { %2900 = vmatpush1.bf16.msra.mxu1 %v2899_v41  ;;  %2822 = vmatprep.subr.bf16.mxu0 %v2821_v42  ;;  %v910_v41 = vld [vmem:[#allocation5 + $0x1320] sm:$0xff]  ;;  %v453_v35 = vld [vmem:[#allocation5 + $0x4d8] sm:$0xff] }
 0x127   : > { %2902 = vmatprep.subr.bf16.mxu1 %v2901_v45  ;;  %v926_v42 = vld [vmem:[#allocation5 + $0x13a0] sm:$0xff]  ;;  %v307_v45 = vld [vmem:[#allocation5 + $0x48] sm:$0xff] }
 0x128   : > { %v2843_v49 = vpack.c.bf16 %v926_v42, %v910_v41  ;;  %v436_v41 = vld [vmem:[#allocation5 + $0x450] sm:$0xff]  ;;  %v3021_v42 = vpack.c.bf16 %v453_v35, %v437_v34 }
 0x129   : > { %2824 = vmatpush1.bf16.msra.mxu0 %v2823_v51  ;;  %v2925_v51 = vpack.c.bf16 %v323_v46, %v307_v45  ;;  %v469_v45 = vld [vmem:[#allocation5 + $0x558] sm:$0xff]  ;;  %v3023_v48 = vpack.c.bf16 %v452_v16, %v436_v41  ;;  %v612_v41 = vld [vmem:[#allocation5 + $0x9d0] sm:$0xff]  ;;  %v643_v16 = vld [vmem:[#allocation5 + $0xac8] sm:$0xff] }
 0x12a   : > { %2904 = vmatpush1.bf16.msra.mxu1 %v2903_v52  ;;  %2826 = vmatprep.subr.bf16.mxu0 %v2825_v53  ;;  %v306_v52 = vld [vmem:[#allocation5 + $0x40] sm:$0xff]  ;;  %v485_v46 = vld [vmem:[#allocation5 + $0x5d8] sm:$0xff] }
 0x12b   : > { %2906 = vmatprep.subr.bf16.mxu1 %v2905_v57  ;;  %v322_v53 = vld [vmem:[#allocation5 + $0xc0] sm:$0xff]  ;;  %v339_v57 = vld [vmem:[#allocation5 + $0x148] sm:$0xff] }
 0x12c   : > { %v2927_v61 = vpack.c.bf16 %v322_v53, %v306_v52  ;;  %v468_v52 = vld [vmem:[#allocation5 + $0x550] sm:$0xff]  ;;  %v3025_v53 = vpack.c.bf16 %v485_v46, %v469_v45 }
 0x12d   : > { %2828 = vmatpush1.bf16.msra.mxu0 %v2827_v63  ;;  %v2929_v63 = vpack.c.bf16 %v355_v58, %v339_v57  ;;  %v501_v57 = vld [vmem:[#allocation5 + $0x658] sm:$0xff]  ;;  %v3027_v60 = vpack.c.bf16 %v484_v54, %v468_v52  ;;  %v644_v52 = vld [vmem:[#allocation5 + $0xad0] sm:$0xff]  ;;  %v675_v54 = vld [vmem:[#allocation5 + $0xbc8] sm:$0xff] }
 0x12e   : > { %2908 = vmatpush1.bf16.msra.mxu1 %v2907_v0  ;;  %2830 = vmatprep.subr.bf16.mxu0 %v2829_v1  ;;  %v338_v0 = vld [vmem:[#allocation5 + $0x140] sm:$0xff]  ;;  %v517_v58 = vld [vmem:[#allocation5 + $0x6d8] sm:$0xff] }
 0x12f   : > { %2910 = vmatprep.subr.bf16.mxu1 %v2909_v6  ;;  %v354_v1 = vld [vmem:[#allocation5 + $0x1c0] sm:$0xff]  ;;  %v371_v6 = vld [vmem:[#allocation5 + $0x248] sm:$0xff] }
 0x130   : > { %1375 = vmatmul.mubr.f32.vlgmr.msra.gmra.mrb[2].mxu0 %v3926_v15  ;;  %v2931_v10 = vpack.c.bf16 %v354_v1, %v338_v0  ;;  %v500_v0 = vld [vmem:[#allocation5 + $0x650] sm:$0xff]  ;;  %v3029_v1 = vpack.c.bf16 %v517_v58, %v501_v57 }
 0x131   : > { %2832 = vmatpush1.bf16.msra.mxu0 %v2831_v12  ;;  %1517 = vmatmul.mubr.f32.vlgmr.msra.gmra.mrb[2].mxu1 %v3926_v15  ;;  %v2839_v15 = vpack.c.bf16 %v894_v30, %v878_v29  ;;  %v2933_v12 = vpack.c.bf16 %v387_v7, %v371_v6  ;;  %v404_v29 = vld [vmem:[#allocation5 + $0x350] sm:$0xff]  ;;  %v533_v6 = vld [vmem:[#allocation5 + $0x758] sm:$0xff]  ;;  %v3031_v9 = vpack.c.bf16 %v516_v3, %v500_v0  ;;  %v707_v3 = vld [vmem:[#allocation5 + $0xcc8] sm:$0xff] }
 0x132   : > { %2912 = vmatpush1.bf16.msra.mxu1 %v2911_v13  ;;  %2834 = vmatprep.subr.bf16.mxu0 %v2833_v14  ;;  %v370_v13 = vld [vmem:[#allocation5 + $0x240] sm:$0xff]  ;;  %v3019_v37 = vpack.c.bf16 %v420_v31, %v404_v29  ;;  %v549_v7 = vld [vmem:[#allocation5 + $0x7d8] sm:$0xff]  ;;  %v580_v29 = vld [vmem:[#allocation5 + $0x8d0] sm:$0xff] }
 0x133   : > { %2914 = vmatprep.subr.bf16.mxu1 %v2913_v20  ;;  %1445 = vmatprep.mubr.f32.mxu0 %v3664_v39  ;;  %v386_v14 = vld [vmem:[#allocation5 + $0x2c0] sm:$0xff]  ;;  %v403_v20 = vld [vmem:[#allocation5 + $0x348] sm:$0xff]  ;;  %v676_v0 = vld [vmem:[#allocation5 + $0xbd0] sm:$0xff] }
 0x134   : > { %1587 = vmatprep.mubr.f32.mxu1 %v3664_v39  ;;  %v2935_v24 = vpack.c.bf16 %v386_v14, %v370_v13  ;;  %v532_v13 = vld [vmem:[#allocation5 + $0x750] sm:$0xff]  ;;  %v3033_v14 = vpack.c.bf16 %v549_v7, %v533_v6  ;;  %v611_v31 = vld [vmem:[#allocation5 + $0x9c8] sm:$0xff] }
 0x135   : > { %2836 = vmatpush1.bf16.msra.mxu0 %v2835_v26  ;;  %v2937_v26 = vpack.c.bf16 %v419_v21, %v403_v20  ;;  %v565_v20 = vld [vmem:[#allocation5 + $0x858] sm:$0xff] }
 0x136   : > { %2916 = vmatpush1.bf16.msra.mxu1 %v2915_v27  ;;  %2838 = vmatprep.subr.bf16.mxu0 %v2837_v28  ;;  %v402_v27 = vld [vmem:[#allocation5 + $0x340] sm:$0xff]  ;;  %v581_v21 = vld [vmem:[#allocation5 + $0x8d8] sm:$0xff] }
 0x137   : > { %2918 = vmatprep.subr.bf16.mxu1 %v2917_v32  ;;  %v418_v28 = vld [vmem:[#allocation5 + $0x3c0] sm:$0xff]  ;;  %v435_v32 = vld [vmem:[#allocation5 + $0x448] sm:$0xff] }
 0x138   : > { %v2939_v36 = vpack.c.bf16 %v418_v28, %v402_v27  ;;  %v564_v27 = vld [vmem:[#allocation5 + $0x850] sm:$0xff]  ;;  %v3037_v28 = vpack.c.bf16 %v581_v21, %v565_v20 }
 0x139   : > { %2840 = vmatpush1.bf16.msra.mxu0 %v2839_v15  ;;  %v2941_v15 = vpack.c.bf16 %v451_v33, %v435_v32  ;;  %v597_v32 = vld [vmem:[#allocation5 + $0x958] sm:$0xff]  ;;  %v3039_v35 = vpack.c.bf16 %v580_v29, %v564_v27  ;;  %v740_v27 = vld [vmem:[#allocation5 + $0xdd0] sm:$0xff]  ;;  %v771_v29 = vld [vmem:[#allocation5 + $0xec8] sm:$0xff] }
 0x13a   : > { %2920 = vmatpush1.bf16.msra.mxu1 %v2919_v38  ;;  %2842 = vmatprep.subr.bf16.mxu0 %v2841_v40  ;;  %v434_v38 = vld [vmem:[#allocation5 + $0x440] sm:$0xff]  ;;  %v613_v33 = vld [vmem:[#allocation5 + $0x9d8] sm:$0xff] }
 0x13b   : > { %2922 = vmatprep.subr.bf16.mxu1 %v2921_v43  ;;  %v450_v40 = vld [vmem:[#allocation5 + $0x4c0] sm:$0xff]  ;;  %v467_v43 = vld [vmem:[#allocation5 + $0x548] sm:$0xff] }
 0x13c   : > { %v2943_v47 = vpack.c.bf16 %v450_v40, %v434_v38  ;;  %v596_v38 = vld [vmem:[#allocation5 + $0x950] sm:$0xff]  ;;  %v3041_v40 = vpack.c.bf16 %v613_v33, %v597_v32 }
 0x13d   : > { %2844 = vmatpush1.bf16.msra.mxu0 %v2843_v49  ;;  %v2945_v49 = vpack.c.bf16 %v483_v44, %v467_v43  ;;  %v629_v43 = vld [vmem:[#allocation5 + $0xa58] sm:$0xff]  ;;  %v3043_v46 = vpack.c.bf16 %v612_v41, %v596_v38  ;;  %v772_v38 = vld [vmem:[#allocation5 + $0xed0] sm:$0xff]  ;;  %v803_v41 = vld [vmem:[#allocation5 + $0xfc8] sm:$0xff] }
 0x13e   : > { %2924 = vmatpush1.bf16.msra.mxu1 %v2923_v50  ;;  %2926 = vmatprep.subr.bf16.mxu0 %v2925_v51  ;;  %v466_v50 = vld [vmem:[#allocation5 + $0x540] sm:$0xff]  ;;  %v645_v44 = vld [vmem:[#allocation5 + $0xad8] sm:$0xff] }
 0x13f   : > { %3006 = vmatprep.subr.bf16.mxu1 %v3005_v55  ;;  %v482_v51 = vld [vmem:[#allocation5 + $0x5c0] sm:$0xff]  ;;  %v499_v55 = vld [vmem:[#allocation5 + $0x648] sm:$0xff] }
 0x140   : > { %2524 = vmatmul.mubr.msk.f32.vlgmr.msra.gmra.mrb[2].mxu0 %vm1022_vm0, %v3933_v2  ;;  %v2947_v59 = vpack.c.bf16 %v482_v51, %v466_v50  ;;  %v628_v50 = vld [vmem:[#allocation5 + $0xa50] sm:$0xff]  ;;  %v3045_v51 = vpack.c.bf16 %v645_v44, %v629_v43 }
 0x141   : > { %2525 = vmatmul.mubr.msk.f32.vlgmr.msra.gmra.mrb[2].mxu1 %vm1022_vm0, %v3933_v2  ;;  %2928 = vmatpush1.bf16.msra.mxu0 %v2927_v61  ;;  %v421_v2 = vld [vmem:[#allocation5 + $0x3d8] sm:$0xff]  ;;  %v2949_v61 = vpack.c.bf16 %v515_v56, %v499_v55  ;;  %v3047_v58 = vpack.c.bf16 %v644_v52, %v628_v50  ;;  %v804_v50 = vld [vmem:[#allocation5 + $0xfd0] sm:$0xff]  ;;  %v835_v52 = vld [vmem:[#allocation5 + $0x10c8] sm:$0xff] }
 0x142   : > { %3008 = vmatpush1.bf16.msra.mxu1 %v3007_v62  ;;  %2930 = vmatprep.subr.bf16.mxu0 %v2929_v63  ;;  %v3017_v30 = vpack.c.bf16 %v421_v2, %v405_v23  ;;  %v498_v62 = vld [vmem:[#allocation5 + $0x640] sm:$0xff]  ;;  %v3035_v2 = vpack.c.bf16 %v548_v17, %v532_v13  ;;  %v661_v55 = vld [vmem:[#allocation5 + $0xb58] sm:$0xff]  ;;  %v708_v13 = vld [vmem:[#allocation5 + $0xcd0] sm:$0xff] }
 0x143   : > { %3010 = vmatprep.subr.bf16.mxu1 %v3009_v4  ;;  %1658 = vmatprep.mubr.f32.mxu0 %v3950_v22  ;;  %v514_v63 = vld [vmem:[#allocation5 + $0x6c0] sm:$0xff]  ;;  %v531_v4 = vld [vmem:[#allocation5 + $0x748] sm:$0xff]  ;;  %v677_v56 = vld [vmem:[#allocation5 + $0xbd8] sm:$0xff] }
 0x144   : > { %1800 = vmatprep.mubr.f32.mxu1 %v3950_v22  ;;  %v2951_v8 = vpack.c.bf16 %v514_v63, %v498_v62  ;;  %v660_v62 = vld [vmem:[#allocation5 + $0xb50] sm:$0xff]  ;;  %v3049_v63 = vpack.c.bf16 %v677_v56, %v661_v55  ;;  %v739_v17 = vld [vmem:[#allocation5 + $0xdc8] sm:$0xff] }
 0x145   : > { %2932 = vmatpush1.bf16.msra.mxu0 %v2931_v10  ;;  %v2953_v10 = vpack.c.bf16 %v547_v5, %v531_v4  ;;  %v693_v4 = vld [vmem:[#allocation5 + $0xc58] sm:$0xff]  ;;  %v3051_v7 = vpack.c.bf16 %v676_v0, %v660_v62  ;;  %v836_v62 = vld [vmem:[#allocation5 + $0x10d0] sm:$0xff]  ;;  %v867_v0 = vld [vmem:[#allocation5 + $0x11c8] sm:$0xff] }
 0x146   : > { %3012 = vmatpush1.bf16.msra.mxu1 %v3011_v11  ;;  %2934 = vmatprep.subr.bf16.mxu0 %v2933_v12  ;;  %v530_v11 = vld [vmem:[#allocation5 + $0x740] sm:$0xff]  ;;  %v709_v5 = vld [vmem:[#allocation5 + $0xcd8] sm:$0xff] }
 0x147   : > { %3014 = vmatprep.subr.bf16.mxu1 %v3013_v18  ;;  %v546_v12 = vld [vmem:[#allocation5 + $0x7c0] sm:$0xff]  ;;  %v563_v18 = vld [vmem:[#allocation5 + $0x848] sm:$0xff] }
 0x148   : > { %v2955_v23 = vpack.c.bf16 %v546_v12, %v530_v11  ;;  %v692_v11 = vld [vmem:[#allocation5 + $0xc50] sm:$0xff]  ;;  %v3053_v12 = vpack.c.bf16 %v709_v5, %v693_v4 }
 0x149   : > { %2936 = vmatpush1.bf16.msra.mxu0 %v2935_v24  ;;  %v2957_v24 = vpack.c.bf16 %v579_v19, %v563_v18  ;;  %v725_v18 = vld [vmem:[#allocation5 + $0xd58] sm:$0xff]  ;;  %v3055_v21 = vpack.c.bf16 %v708_v13, %v692_v11  ;;  %v868_v11 = vld [vmem:[#allocation5 + $0x11d0] sm:$0xff]  ;;  %v899_v13 = vld [vmem:[#allocation5 + $0x12c8] sm:$0xff] }
 0x14a   : > { %3016 = vmatpush1.bf16.msra.mxu1 %v3015_v25  ;;  %2938 = vmatprep.subr.bf16.mxu0 %v2937_v26  ;;  %v562_v25 = vld [vmem:[#allocation5 + $0x840] sm:$0xff]  ;;  %v741_v19 = vld [vmem:[#allocation5 + $0xdd8] sm:$0xff] }
 0x14b   : > { %3018 = vmatprep.subr.bf16.mxu1 %v3017_v30  ;;  %v578_v26 = vld [vmem:[#allocation5 + $0x8c0] sm:$0xff]  ;;  %v595_v30 = vld [vmem:[#allocation5 + $0x948] sm:$0xff] }
 0x14c   : > { %v2959_v34 = vpack.c.bf16 %v578_v26, %v562_v25  ;;  %v724_v25 = vld [vmem:[#allocation5 + $0xd50] sm:$0xff]  ;;  %v3057_v26 = vpack.c.bf16 %v741_v19, %v725_v18  ;;  %v901_v18 = vld [vmem:[#allocation5 + $0x12d8] sm:$0xff] }
 0x14d   : > { %2940 = vmatpush1.bf16.msra.mxu0 %v2939_v36  ;;  %v2961_v36 = vpack.c.bf16 %v611_v31, %v595_v30  ;;  %v757_v30 = vld [vmem:[#allocation5 + $0xe58] sm:$0xff]  ;;  %v3059_v33 = vpack.c.bf16 %v740_v27, %v724_v25  ;;  %v915_v27 = vld [vmem:[#allocation5 + $0x1348] sm:$0xff] }
 0x14e   : > { %3020 = vmatpush1.bf16.msra.mxu1 %v3019_v37  ;;  %2942 = vmatprep.subr.bf16.mxu0 %v2941_v15  ;;  %v594_v37 = vld [vmem:[#allocation5 + $0x940] sm:$0xff]  ;;  %v773_v31 = vld [vmem:[#allocation5 + $0xed8] sm:$0xff] }
 0x14f   : > { %3022 = vmatprep.subr.bf16.mxu1 %v3021_v42  ;;  %v610_v15 = vld [vmem:[#allocation5 + $0x9c0] sm:$0xff]  ;;  %v627_v42 = vld [vmem:[#allocation5 + $0xa48] sm:$0xff] }
 0x150   : > { %v2963_v45 = vpack.c.bf16 %v610_v15, %v594_v37  ;;  %v756_v37 = vld [vmem:[#allocation5 + $0xe50] sm:$0xff]  ;;  %v3061_v15 = vpack.c.bf16 %v773_v31, %v757_v30  ;;  %v933_v30 = vld [vmem:[#allocation5 + $0x13d8] sm:$0xff] }
 0x151   : > { %2944 = vmatpush1.bf16.msra.mxu0 %v2943_v47  ;;  %v2965_v47 = vpack.c.bf16 %v643_v16, %v627_v42  ;;  %v789_v42 = vld [vmem:[#allocation5 + $0xf58] sm:$0xff]  ;;  %v3063_v44 = vpack.c.bf16 %v772_v38, %v756_v37  ;;  %v311_v38 = vld [vmem:[#allocation5 + $0x68] sm:$0xff] }
 0x152   : > { %3024 = vmatpush1.bf16.msra.mxu1 %v3023_v48  ;;  %2946 = vmatprep.subr.bf16.mxu0 %v2945_v49  ;;  %v626_v48 = vld [vmem:[#allocation5 + $0xa40] sm:$0xff]  ;;  %v805_v16 = vld [vmem:[#allocation5 + $0xfd8] sm:$0xff] }
 0x153   : > { %3026 = vmatprep.subr.bf16.mxu1 %v3025_v53  ;;  %v642_v49 = vld [vmem:[#allocation5 + $0xac0] sm:$0xff]  ;;  %v659_v53 = vld [vmem:[#allocation5 + $0xb48] sm:$0xff] }
 0x154   : > { %v2967_v57 = vpack.c.bf16 %v642_v49, %v626_v48  ;;  %v788_v48 = vld [vmem:[#allocation5 + $0xf50] sm:$0xff]  ;;  %v3065_v49 = vpack.c.bf16 %v805_v16, %v789_v42  ;;  %v329_v42 = vld [vmem:[#allocation5 + $0xf8] sm:$0xff] }
 0x155   : > { %2948 = vmatpush1.bf16.msra.mxu0 %v2947_v59  ;;  %v2969_v59 = vpack.c.bf16 %v675_v54, %v659_v53  ;;  %v821_v53 = vld [vmem:[#allocation5 + $0x1058] sm:$0xff]  ;;  %v3067_v56 = vpack.c.bf16 %v804_v50, %v788_v48  ;;  %v343_v50 = vld [vmem:[#allocation5 + $0x168] sm:$0xff] }
 0x156   : > { %3028 = vmatpush1.bf16.msra.mxu1 %v3027_v60  ;;  %2950 = vmatprep.subr.bf16.mxu0 %v2949_v61  ;;  %v658_v60 = vld [vmem:[#allocation5 + $0xb40] sm:$0xff]  ;;  %v837_v54 = vld [vmem:[#allocation5 + $0x10d8] sm:$0xff] }
 0x157   : > { %3030 = vmatprep.subr.bf16.mxu1 %v3029_v1  ;;  %v674_v61 = vld [vmem:[#allocation5 + $0xbc0] sm:$0xff]  ;;  %v691_v1 = vld [vmem:[#allocation5 + $0xc48] sm:$0xff] }
 0x158   : > { %v2971_v6 = vpack.c.bf16 %v674_v61, %v658_v60  ;;  %v820_v60 = vld [vmem:[#allocation5 + $0x1050] sm:$0xff]  ;;  %v3069_v61 = vpack.c.bf16 %v837_v54, %v821_v53  ;;  %v361_v53 = vld [vmem:[#allocation5 + $0x1f8] sm:$0xff] }
 0x159   : > { %2952 = vmatpush1.bf16.msra.mxu0 %v2951_v8  ;;  %v2973_v8 = vpack.c.bf16 %v707_v3, %v691_v1  ;;  %v853_v1 = vld [vmem:[#allocation5 + $0x1158] sm:$0xff]  ;;  %v3071_v5 = vpack.c.bf16 %v836_v62, %v820_v60  ;;  %v375_v62 = vld [vmem:[#allocation5 + $0x268] sm:$0xff] }
 0x15a   : > { %3032 = vmatpush1.bf16.msra.mxu1 %v3031_v9  ;;  %2954 = vmatprep.subr.bf16.mxu0 %v2953_v10  ;;  %v690_v9 = vld [vmem:[#allocation5 + $0xc40] sm:$0xff]  ;;  %v869_v3 = vld [vmem:[#allocation5 + $0x11d8] sm:$0xff] }
 0x15b   : > { %3034 = vmatprep.subr.bf16.mxu1 %v3033_v14  ;;  %v706_v10 = vld [vmem:[#allocation5 + $0xcc0] sm:$0xff]  ;;  %v723_v14 = vld [vmem:[#allocation5 + $0xd48] sm:$0xff] }
 0x15c   : > { %v2975_v20 = vpack.c.bf16 %v706_v10, %v690_v9  ;;  %v852_v9 = vld [vmem:[#allocation5 + $0x1150] sm:$0xff]  ;;  %v3073_v10 = vpack.c.bf16 %v869_v3, %v853_v1  ;;  %v377_v1 = vld [vmem:[#allocation5 + $0x278] sm:$0xff] }
 0x15d   : > { %2956 = vmatpush1.bf16.msra.mxu0 %v2955_v23  ;;  %v2977_v23 = vpack.c.bf16 %v739_v17, %v723_v14  ;;  %v3955_v14 = vld [vmem:[%s3906_s9] sm:$0xff]  ;;  %v885_v17 = vld [vmem:[#allocation5 + $0x1258] sm:$0xff] }
 0x15e   : > { %3036 = vmatpush1.bf16.msra.mxu1 %v3035_v2  ;;  %2958 = vmatprep.subr.bf16.mxu0 %v2957_v24  ;;  %v722_v2 = vld [vmem:[#allocation5 + $0xd40] sm:$0xff]  ;;  %v3077_v25 = vpack.c.bf16 %v901_v18, %v885_v17  ;;  %v393_v3 = vld [vmem:[#allocation5 + $0x2f8] sm:$0xff] }
 0x15f   : > { %3038 = vmatprep.subr.bf16.mxu1 %v3037_v28  ;;  %v738_v24 = vld [vmem:[#allocation5 + $0xdc0] sm:$0xff]  ;;  %v755_v28 = vld [vmem:[#allocation5 + $0xe48] sm:$0xff]  ;;  %v409_v17 = vld [vmem:[#allocation5 + $0x378] sm:$0xff] }
 0x160   : > { %v2979_v32 = vpack.c.bf16 %v738_v24, %v722_v2  ;;  %v898_v2 = vld [vmem:[#allocation5 + $0x12c0] sm:$0xff]  ;;  %v884_v24 = vld [vmem:[#allocation5 + $0x1250] sm:$0xff]  ;;  %v425_v18 = vld [vmem:[#allocation5 + $0x3f8] sm:$0xff] }
 0x161   : > { %2960 = vmatpush1.bf16.msra.mxu0 %v2959_v34  ;;  %v2981_v34 = vpack.c.bf16 %v771_v29, %v755_v28  ;;  %v931_v28 = vld [vmem:[#allocation5 + $0x13c8] sm:$0xff]  ;;  %v917_v29 = vld [vmem:[#allocation5 + $0x1358] sm:$0xff] }
 0x162   : > { %3040 = vmatpush1.bf16.msra.mxu1 %v3039_v35  ;;  %2962 = vmatprep.subr.bf16.mxu0 %v2961_v36  ;;  %v754_v35 = vld [vmem:[#allocation5 + $0xe40] sm:$0xff]  ;;  %v3081_v37 = vpack.c.bf16 %v933_v30, %v917_v29  ;;  %v441_v29 = vld [vmem:[#allocation5 + $0x478] sm:$0xff] }
 0x163   : > { %3042 = vmatprep.subr.bf16.mxu1 %v3041_v40  ;;  %v770_v36 = vld [vmem:[#allocation5 + $0xec0] sm:$0xff]  ;;  %v787_v40 = vld [vmem:[#allocation5 + $0xf48] sm:$0xff]  ;;  %v457_v30 = vld [vmem:[#allocation5 + $0x4f8] sm:$0xff] }
 0x164   : > { %v2983_v43 = vpack.c.bf16 %v770_v36, %v754_v35  ;;  %v930_v35 = vld [vmem:[#allocation5 + $0x13c0] sm:$0xff]  ;;  %v916_v36 = vld [vmem:[#allocation5 + $0x1350] sm:$0xff] }
 0x165   : > { %2964 = vmatpush1.bf16.msra.mxu0 %v2963_v45  ;;  %v2985_v45 = vpack.c.bf16 %v803_v41, %v787_v40  ;;  %v327_v40 = vld [vmem:[#allocation5 + $0xe8] sm:$0xff]  ;;  %v313_v41 = vld [vmem:[#allocation5 + $0x78] sm:$0xff] }
 0x166   : > { %3044 = vmatpush1.bf16.msra.mxu1 %v3043_v46  ;;  %2966 = vmatprep.subr.bf16.mxu0 %v2965_v47  ;;  %v786_v46 = vld [vmem:[#allocation5 + $0xf40] sm:$0xff]  ;;  %v3165_v48 = vpack.c.bf16 %v329_v42, %v313_v41  ;;  %v489_v41 = vld [vmem:[#allocation5 + $0x5f8] sm:$0xff] }
 0x167   : > { %3046 = vmatprep.subr.bf16.mxu1 %v3045_v51  ;;  %v802_v47 = vld [vmem:[#allocation5 + $0xfc0] sm:$0xff]  ;;  %v819_v51 = vld [vmem:[#allocation5 + $0x1048] sm:$0xff] }
 0x168   : > { %v2987_v55 = vpack.c.bf16 %v802_v47, %v786_v46  ;;  %v326_v46 = vld [vmem:[#allocation5 + $0xe0] sm:$0xff]  ;;  %v312_v47 = vld [vmem:[#allocation5 + $0x70] sm:$0xff] }
 0x169   : > { %2968 = vmatpush1.bf16.msra.mxu0 %v2967_v57  ;;  %v2989_v57 = vpack.c.bf16 %v835_v52, %v819_v51  ;;  %v359_v51 = vld [vmem:[#allocation5 + $0x1e8] sm:$0xff]  ;;  %v345_v52 = vld [vmem:[#allocation5 + $0x178] sm:$0xff] }
 0x16a   : > { %3048 = vmatpush1.bf16.msra.mxu1 %v3047_v58  ;;  %2970 = vmatprep.subr.bf16.mxu0 %v2969_v59  ;;  %v818_v58 = vld [vmem:[#allocation5 + $0x1040] sm:$0xff]  ;;  %v3169_v60 = vpack.c.bf16 %v361_v53, %v345_v52  ;;  %v521_v52 = vld [vmem:[#allocation5 + $0x6f8] sm:$0xff] }
 0x16b   : > { %3050 = vmatprep.subr.bf16.mxu1 %v3049_v63  ;;  %v834_v59 = vld [vmem:[#allocation5 + $0x10c0] sm:$0xff]  ;;  %v851_v63 = vld [vmem:[#allocation5 + $0x1148] sm:$0xff] }
 0x16c   : > { %v2991_v4 = vpack.c.bf16 %v834_v59, %v818_v58  ;;  %v358_v58 = vld [vmem:[#allocation5 + $0x1e0] sm:$0xff]  ;;  %v344_v59 = vld [vmem:[#allocation5 + $0x170] sm:$0xff] }
 0x16d   : > { %2972 = vmatpush1.bf16.msra.mxu0 %v2971_v6  ;;  %v2993_v6 = vpack.c.bf16 %v867_v0, %v851_v63  ;;  %v391_v63 = vld [vmem:[#allocation5 + $0x2e8] sm:$0xff]  ;;  %v3962_v0 = vld [vmem:[%s3906_s9 + $0x10] sm:$0xff] }
 0x16e   : > { %3052 = vmatpush1.bf16.msra.mxu1 %v3051_v7  ;;  %2974 = vmatprep.subr.bf16.mxu0 %v2973_v8  ;;  %v850_v7 = vld [vmem:[#allocation5 + $0x1140] sm:$0xff] }
 0x16f   : > { %3054 = vmatprep.subr.bf16.mxu1 %v3053_v12  ;;  %v866_v8 = vld [vmem:[#allocation5 + $0x11c0] sm:$0xff]  ;;  %v883_v12 = vld [vmem:[#allocation5 + $0x1248] sm:$0xff] }
 0x170   : > { %v2995_v19 = vpack.c.bf16 %v866_v8, %v850_v7  ;;  %v374_v7 = vld [vmem:[#allocation5 + $0x260] sm:$0xff] }
 0x171   : > { %2976 = vmatpush1.bf16.msra.mxu0 %v2975_v20  ;;  %v3075_v20 = vpack.c.bf16 %v868_v11, %v852_v9  ;;  %v390_v8 = vld [vmem:[#allocation5 + $0x2e0] sm:$0xff]  ;;  %v376_v9 = vld [vmem:[#allocation5 + $0x270] sm:$0xff] }
 0x172   : > { %3056 = vmatpush1.bf16.msra.mxu1 %v3055_v21  ;;  %2978 = vmatprep.subr.bf16.mxu0 %v2977_v23  ;;  %v2997_v21 = vpack.c.bf16 %v899_v13, %v883_v12  ;;  %v882_v23 = vld [vmem:[#allocation5 + $0x1240] sm:$0xff]  ;;  %v392_v11 = vld [vmem:[#allocation5 + $0x2f0] sm:$0xff]  ;;  %v407_v12 = vld [vmem:[#allocation5 + $0x368] sm:$0xff] }
 0x173   : > { %3058 = vmatprep.subr.bf16.mxu1 %v3057_v26  ;;  %v900_v26 = vld [vmem:[#allocation5 + $0x12d0] sm:$0xff]  ;;  %v2999_v31 = vpack.c.bf16 %v898_v2, %v882_v23  ;;  %v423_v13 = vld [vmem:[#allocation5 + $0x3e8] sm:$0xff]  ;;  %v406_v23 = vld [vmem:[#allocation5 + $0x360] sm:$0xff] }
 0x174   : > { %v422_v2 = vld [vmem:[#allocation5 + $0x3e0] sm:$0xff] }
 0x175   : > { %2980 = vmatpush1.bf16.msra.mxu0 %v2979_v32  ;;  %v3079_v32 = vpack.c.bf16 %v900_v26, %v884_v24  ;;  %v408_v24 = vld [vmem:[#allocation5 + $0x370] sm:$0xff] }
 0x176   : > { %3060 = vmatpush1.bf16.msra.mxu1 %v3059_v33  ;;  %2982 = vmatprep.subr.bf16.mxu0 %v2981_v34  ;;  %v3001_v33 = vpack.c.bf16 %v931_v28, %v915_v27  ;;  %v914_v34 = vld [vmem:[#allocation5 + $0x1340] sm:$0xff]  ;;  %v424_v26 = vld [vmem:[#allocation5 + $0x3f0] sm:$0xff]  ;;  %v439_v27 = vld [vmem:[#allocation5 + $0x468] sm:$0xff] }
 0x177   : > { %3062 = vmatprep.subr.bf16.mxu1 %v3061_v15  ;;  %v932_v15 = vld [vmem:[#allocation5 + $0x13d0] sm:$0xff]  ;;  %v3003_v16 = vpack.c.bf16 %v930_v35, %v914_v34  ;;  %v455_v28 = vld [vmem:[#allocation5 + $0x4e8] sm:$0xff]  ;;  %v454_v34 = vld [vmem:[#allocation5 + $0x4e0] sm:$0xff] }
 0x178   : > { %v440_v35 = vld [vmem:[#allocation5 + $0x470] sm:$0xff] }
 0x179   : > { %2984 = vmatpush1.bf16.msra.mxu0 %v2983_v43  ;;  %v3083_v43 = vpack.c.bf16 %v932_v15, %v916_v36  ;;  %v3181_v36 = vpack.c.bf16 %v457_v30, %v441_v29  ;;  %v471_v15 = vld [vmem:[#allocation5 + $0x568] sm:$0xff]  ;;  %v617_v29 = vld [vmem:[#allocation5 + $0x9f8] sm:$0xff] }
 0x17a   : > { %3064 = vmatpush1.bf16.msra.mxu1 %v3063_v44  ;;  %2986 = vmatprep.subr.bf16.mxu0 %v2985_v45  ;;  %v3085_v44 = vpack.c.bf16 %v327_v40, %v311_v38  ;;  %v310_v45 = vld [vmem:[#allocation5 + $0x60] sm:$0xff]  ;;  %v487_v38 = vld [vmem:[#allocation5 + $0x5e8] sm:$0xff]  ;;  %v473_v40 = vld [vmem:[#allocation5 + $0x578] sm:$0xff] }
 0x17b   : > { %3066 = vmatprep.subr.bf16.mxu1 %v3065_v49  ;;  %v328_v49 = vld [vmem:[#allocation5 + $0xf0] sm:$0xff]  ;;  %v3087_v54 = vpack.c.bf16 %v326_v46, %v310_v45  ;;  %v486_v45 = vld [vmem:[#allocation5 + $0x5e0] sm:$0xff] }
 0x17c   : > { %v472_v46 = vld [vmem:[#allocation5 + $0x570] sm:$0xff] }
 0x17d   : > { %2988 = vmatpush1.bf16.msra.mxu0 %v2987_v55  ;;  %v3167_v55 = vpack.c.bf16 %v328_v49, %v312_v47  ;;  %v3185_v47 = vpack.c.bf16 %v489_v41, %v473_v40  ;;  %v503_v49 = vld [vmem:[#allocation5 + $0x668] sm:$0xff]  ;;  %v649_v40 = vld [vmem:[#allocation5 + $0xaf8] sm:$0xff] }
 0x17e   : > { %3068 = vmatpush1.bf16.msra.mxu1 %v3067_v56  ;;  %2990 = vmatprep.subr.bf16.mxu0 %v2989_v57  ;;  %v3089_v56 = vpack.c.bf16 %v359_v51, %v343_v50  ;;  %v342_v57 = vld [vmem:[#allocation5 + $0x160] sm:$0xff]  ;;  %v519_v50 = vld [vmem:[#allocation5 + $0x6e8] sm:$0xff]  ;;  %v505_v51 = vld [vmem:[#allocation5 + $0x678] sm:$0xff] }
 0x17f   : > { %3070 = vmatprep.subr.bf16.mxu1 %v3069_v61  ;;  %v360_v61 = vld [vmem:[#allocation5 + $0x1f0] sm:$0xff] }
 0x180   : > { %1659 = vmatmul.mubr.f32.vlgmr.msra.gmra.mrb[4].mxu0 %v3955_v14 }
 0x181   : > { %2992 = vmatpush1.bf16.msra.mxu0 %v2991_v4  ;;  %1801 = vmatmul.mubr.f32.vlgmr.msra.gmra.mrb[4].mxu1 %v3955_v14  ;;  %v3091_v4 = vpack.c.bf16 %v358_v58, %v342_v57  ;;  %v518_v57 = vld [vmem:[#allocation5 + $0x6e0] sm:$0xff]  ;;  %v504_v58 = vld [vmem:[#allocation5 + $0x670] sm:$0xff] }
 0x182   : > { %3072 = vmatpush1.bf16.msra.mxu1 %v3071_v5  ;;  %2994 = vmatprep.subr.bf16.mxu0 %v2993_v6  ;;  %v3171_v5 = vpack.c.bf16 %v360_v61, %v344_v59  ;;  %v3093_v6 = vpack.c.bf16 %v391_v63, %v375_v62  ;;  %v3189_v59 = vpack.c.bf16 %v521_v52, %v505_v51  ;;  %v535_v61 = vld [vmem:[#allocation5 + $0x768] sm:$0xff]  ;;  %v537_v63 = vld [vmem:[#allocation5 + $0x778] sm:$0xff] }
 0x183   : > { %3074 = vmatprep.subr.bf16.mxu1 %v3073_v10  ;;  %1729 = vmatprep.mubr.f32.mxu0 %v3664_v39  ;;  %v3173_v10 = vpack.c.bf16 %v393_v3, %v377_v1  ;;  %v551_v62 = vld [vmem:[#allocation5 + $0x7e8] sm:$0xff]  ;;  %v553_v1 = vld [vmem:[#allocation5 + $0x7f8] sm:$0xff] }
 0x184   : > { %1871 = vmatprep.mubr.f32.mxu1 %v3664_v39  ;;  %v681_v51 = vld [vmem:[#allocation5 + $0xbf8] sm:$0xff] }
 0x185   : > { %2996 = vmatpush1.bf16.msra.mxu0 %v2995_v19  ;;  %v3095_v19 = vpack.c.bf16 %v390_v8, %v374_v7  ;;  %v550_v7 = vld [vmem:[#allocation5 + $0x7e0] sm:$0xff]  ;;  %v536_v8 = vld [vmem:[#allocation5 + $0x770] sm:$0xff] }
 0x186   : > { %3076 = vmatpush1.bf16.msra.mxu1 %v3075_v20  ;;  %2998 = vmatprep.subr.bf16.mxu0 %v2997_v21  ;;  %v3175_v20 = vpack.c.bf16 %v392_v11, %v376_v9  ;;  %v3097_v21 = vpack.c.bf16 %v423_v13, %v407_v12  ;;  %v3193_v9 = vpack.c.bf16 %v553_v1, %v537_v63  ;;  %v567_v11 = vld [vmem:[#allocation5 + $0x868] sm:$0xff]  ;;  %v569_v13 = vld [vmem:[#allocation5 + $0x878] sm:$0xff] }
 0x187   : > { %3078 = vmatprep.subr.bf16.mxu1 %v3077_v25  ;;  %v3177_v25 = vpack.c.bf16 %v425_v18, %v409_v17  ;;  %v583_v12 = vld [vmem:[#allocation5 + $0x8e8] sm:$0xff]  ;;  %v585_v17 = vld [vmem:[#allocation5 + $0x8f8] sm:$0xff] }
 0x188   : > { %v713_v63 = vld [vmem:[#allocation5 + $0xcf8] sm:$0xff] }
 0x189   : > { %3000 = vmatpush1.bf16.msra.mxu0 %v2999_v31  ;;  %v3099_v31 = vpack.c.bf16 %v422_v2, %v406_v23  ;;  %v582_v23 = vld [vmem:[#allocation5 + $0x8e0] sm:$0xff]  ;;  %v568_v2 = vld [vmem:[#allocation5 + $0x870] sm:$0xff] }
 0x18a   : > { %3080 = vmatpush1.bf16.msra.mxu1 %v3079_v32  ;;  %3002 = vmatprep.subr.bf16.mxu0 %v3001_v33  ;;  %v3101_v32 = vpack.c.bf16 %v455_v28, %v439_v27  ;;  %v438_v33 = vld [vmem:[#allocation5 + $0x460] sm:$0xff]  ;;  %v615_v27 = vld [vmem:[#allocation5 + $0x9e8] sm:$0xff]  ;;  %v601_v28 = vld [vmem:[#allocation5 + $0x978] sm:$0xff] }
 0x18b   : > { %3082 = vmatprep.subr.bf16.mxu1 %v3081_v37  ;;  %v456_v37 = vld [vmem:[#allocation5 + $0x4f0] sm:$0xff]  ;;  %v3103_v42 = vpack.c.bf16 %v454_v34, %v438_v33  ;;  %v614_v33 = vld [vmem:[#allocation5 + $0x9e0] sm:$0xff] }
 0x18c   : > { %v600_v34 = vld [vmem:[#allocation5 + $0x970] sm:$0xff] }
 0x18d   : > { %3004 = vmatpush1.bf16.msra.mxu0 %v3003_v16  ;;  %v3183_v16 = vpack.c.bf16 %v456_v37, %v440_v35  ;;  %v3201_v35 = vpack.c.bf16 %v617_v29, %v601_v28  ;;  %v631_v37 = vld [vmem:[#allocation5 + $0xa68] sm:$0xff]  ;;  %v777_v28 = vld [vmem:[#allocation5 + $0xef8] sm:$0xff] }
 0x18e   : > { %3084 = vmatpush1.bf16.msra.mxu1 %v3083_v43  ;;  %3086 = vmatprep.subr.bf16.mxu0 %v3085_v44  ;;  %v3105_v43 = vpack.c.bf16 %v487_v38, %v471_v15  ;;  %v470_v44 = vld [vmem:[#allocation5 + $0x560] sm:$0xff]  ;;  %v647_v15 = vld [vmem:[#allocation5 + $0xae8] sm:$0xff]  ;;  %v633_v38 = vld [vmem:[#allocation5 + $0xa78] sm:$0xff] }
 0x18f   : > { %3166 = vmatprep.subr.bf16.mxu1 %v3165_v48  ;;  %v488_v48 = vld [vmem:[#allocation5 + $0x5f0] sm:$0xff]  ;;  %v3107_v53 = vpack.c.bf16 %v486_v45, %v470_v44  ;;  %v646_v44 = vld [vmem:[#allocation5 + $0xae0] sm:$0xff] }
 0x190   : > { %2526 = vmatmul.mubr.msk.f32.vlgmr.msra.gmra.mrb[4].mxu0 %vm1022_vm0, %v3962_v0  ;;  %v632_v45 = vld [vmem:[#allocation5 + $0xa70] sm:$0xff] }
 0x191   : > { %2527 = vmatmul.mubr.msk.f32.vlgmr.msra.gmra.mrb[4].mxu1 %vm1022_vm0, %v3962_v0  ;;  %3088 = vmatpush1.bf16.msra.mxu0 %v3087_v54  ;;  %v3187_v54 = vpack.c.bf16 %v488_v48, %v472_v46  ;;  %v3205_v46 = vpack.c.bf16 %v649_v40, %v633_v38  ;;  %v663_v48 = vld [vmem:[#allocation5 + $0xb68] sm:$0xff] }
 0x192   : > { %3168 = vmatpush1.bf16.msra.mxu1 %v3167_v55  ;;  %3090 = vmatprep.subr.bf16.mxu0 %v3089_v56  ;;  %v3109_v55 = vpack.c.bf16 %v519_v50, %v503_v49  ;;  %v502_v56 = vld [vmem:[#allocation5 + $0x660] sm:$0xff]  ;;  %v679_v49 = vld [vmem:[#allocation5 + $0xbe8] sm:$0xff]  ;;  %v665_v50 = vld [vmem:[#allocation5 + $0xb78] sm:$0xff] }
 0x193   : > { %3170 = vmatprep.subr.bf16.mxu1 %v3169_v60  ;;  %1942 = vmatprep.mubr.f32.mxu0 %v3950_v22  ;;  %v520_v60 = vld [vmem:[#allocation5 + $0x6f0] sm:$0xff]  ;;  %v3111_v3 = vpack.c.bf16 %v518_v57, %v502_v56  ;;  %v678_v56 = vld [vmem:[#allocation5 + $0xbe0] sm:$0xff] }
 0x194   : > { %2084 = vmatprep.mubr.f32.mxu1 %v3950_v22  ;;  %v3179_v22 = vpack.c.bf16 %v424_v26, %v408_v24  ;;  %v3197_v24 = vpack.c.bf16 %v585_v17, %v569_v13  ;;  %v599_v26 = vld [vmem:[#allocation5 + $0x968] sm:$0xff]  ;;  %v664_v57 = vld [vmem:[#allocation5 + $0xb70] sm:$0xff]  ;;  %v745_v13 = vld [vmem:[#allocation5 + $0xdf8] sm:$0xff] }
 0x195   : > { %3092 = vmatpush1.bf16.msra.mxu0 %v3091_v4  ;;  %v3191_v4 = vpack.c.bf16 %v520_v60, %v504_v58  ;;  %v3209_v58 = vpack.c.bf16 %v681_v51, %v665_v50  ;;  %v695_v60 = vld [vmem:[#allocation5 + $0xc68] sm:$0xff]  ;;  %v808_v50 = vld [vmem:[#allocation5 + $0xff0] sm:$0xff] }
 0x196   : > { %3172 = vmatpush1.bf16.msra.mxu1 %v3171_v5  ;;  %3094 = vmatprep.subr.bf16.mxu0 %v3093_v6  ;;  %v3113_v5 = vpack.c.bf16 %v551_v62, %v535_v61  ;;  %v534_v6 = vld [vmem:[#allocation5 + $0x760] sm:$0xff]  ;;  %v711_v61 = vld [vmem:[#allocation5 + $0xce8] sm:$0xff]  ;;  %v697_v62 = vld [vmem:[#allocation5 + $0xc78] sm:$0xff] }
 0x197   : > { %3174 = vmatprep.subr.bf16.mxu1 %v3173_v10  ;;  %v552_v10 = vld [vmem:[#allocation5 + $0x7f0] sm:$0xff]  ;;  %v3115_v18 = vpack.c.bf16 %v550_v7, %v534_v6  ;;  %v710_v6 = vld [vmem:[#allocation5 + $0xce0] sm:$0xff]  ;;  %v823_v51 = vld [vmem:[#allocation5 + $0x1068] sm:$0xff] }
 0x198   : > { %v696_v7 = vld [vmem:[#allocation5 + $0xc70] sm:$0xff] }
 0x199   : > { %3096 = vmatpush1.bf16.msra.mxu0 %v3095_v19  ;;  %v3195_v19 = vpack.c.bf16 %v552_v10, %v536_v8  ;;  %v3213_v8 = vpack.c.bf16 %v713_v63, %v697_v62  ;;  %v727_v10 = vld [vmem:[#allocation5 + $0xd68] sm:$0xff]  ;;  %v840_v62 = vld [vmem:[#allocation5 + $0x10f0] sm:$0xff] }
 0x19a   : > { %3176 = vmatpush1.bf16.msra.mxu1 %v3175_v20  ;;  %3098 = vmatprep.subr.bf16.mxu0 %v3097_v21  ;;  %v3117_v20 = vpack.c.bf16 %v583_v12, %v567_v11  ;;  %v566_v21 = vld [vmem:[#allocation5 + $0x860] sm:$0xff]  ;;  %v743_v11 = vld [vmem:[#allocation5 + $0xde8] sm:$0xff]  ;;  %v729_v12 = vld [vmem:[#allocation5 + $0xd78] sm:$0xff] }
 0x19b   : > { %3178 = vmatprep.subr.bf16.mxu1 %v3177_v25  ;;  %v584_v25 = vld [vmem:[#allocation5 + $0x8f0] sm:$0xff]  ;;  %v3119_v30 = vpack.c.bf16 %v582_v23, %v566_v21  ;;  %v742_v21 = vld [vmem:[#allocation5 + $0xde0] sm:$0xff]  ;;  %v855_v63 = vld [vmem:[#allocation5 + $0x1168] sm:$0xff] }
 0x19c   : > { %v728_v23 = vld [vmem:[#allocation5 + $0xd70] sm:$0xff] }
 0x19d   : > { %3100 = vmatpush1.bf16.msra.mxu0 %v3099_v31  ;;  %v3199_v31 = vpack.c.bf16 %v584_v25, %v568_v2  ;;  %v3217_v2 = vpack.c.bf16 %v745_v13, %v729_v12  ;;  %v759_v25 = vld [vmem:[#allocation5 + $0xe68] sm:$0xff]  ;;  %v872_v12 = vld [vmem:[#allocation5 + $0x11f0] sm:$0xff] }
 0x19e   : > { %3180 = vmatpush1.bf16.msra.mxu1 %v3179_v22  ;;  %3102 = vmatprep.subr.bf16.mxu0 %v3101_v32  ;;  %v3121_v22 = vpack.c.bf16 %v615_v27, %v599_v26  ;;  %v598_v32 = vld [vmem:[#allocation5 + $0x960] sm:$0xff]  ;;  %v775_v26 = vld [vmem:[#allocation5 + $0xee8] sm:$0xff]  ;;  %v761_v27 = vld [vmem:[#allocation5 + $0xe78] sm:$0xff] }
 0x19f   : > { %3182 = vmatprep.subr.bf16.mxu1 %v3181_v36  ;;  %v616_v36 = vld [vmem:[#allocation5 + $0x9f0] sm:$0xff]  ;;  %v3123_v41 = vpack.c.bf16 %v614_v33, %v598_v32  ;;  %v774_v32 = vld [vmem:[#allocation5 + $0xee0] sm:$0xff]  ;;  %v887_v13 = vld [vmem:[#allocation5 + $0x1268] sm:$0xff] }
 0x1a0   : > { %v760_v33 = vld [vmem:[#allocation5 + $0xe70] sm:$0xff] }
 0x1a1   : > { %3104 = vmatpush1.bf16.msra.mxu0 %v3103_v42  ;;  %v3203_v42 = vpack.c.bf16 %v616_v36, %v600_v34  ;;  %v776_v36 = vld [vmem:[#allocation5 + $0xef0] sm:$0xff] }
 0x1a2   : > { %3184 = vmatpush1.bf16.msra.mxu1 %v3183_v16  ;;  %3106 = vmatprep.subr.bf16.mxu0 %v3105_v43  ;;  %v3125_v16 = vpack.c.bf16 %v647_v15, %v631_v37  ;;  %v630_v43 = vld [vmem:[#allocation5 + $0xa60] sm:$0xff]  ;;  %v791_v37 = vld [vmem:[#allocation5 + $0xf68] sm:$0xff] }
 0x1a3   : > { %3186 = vmatprep.subr.bf16.mxu1 %v3185_v47  ;;  %v648_v47 = vld [vmem:[#allocation5 + $0xaf0] sm:$0xff]  ;;  %v3127_v52 = vpack.c.bf16 %v646_v44, %v630_v43  ;;  %v807_v15 = vld [vmem:[#allocation5 + $0xfe8] sm:$0xff]  ;;  %v3223_v44 = vpack.c.bf16 %v776_v36, %v760_v33  ;;  %v918_v33 = vld [vmem:[#allocation5 + $0x1360] sm:$0xff] }
 0x1a5   : > { %3108 = vmatpush1.bf16.msra.mxu0 %v3107_v53  ;;  %v3207_v53 = vpack.c.bf16 %v648_v47, %v632_v45  ;;  %v3145_v45 = vpack.c.bf16 %v807_v15, %v791_v37  ;;  %v806_v47 = vld [vmem:[#allocation5 + $0xfe0] sm:$0xff]  ;;  %v920_v37 = vld [vmem:[#allocation5 + $0x1370] sm:$0xff] }
 0x1a6   : > { %3188 = vmatpush1.bf16.msra.mxu1 %v3187_v54  ;;  %3110 = vmatprep.subr.bf16.mxu0 %v3109_v55  ;;  %v3129_v54 = vpack.c.bf16 %v679_v49, %v663_v48  ;;  %v662_v55 = vld [vmem:[#allocation5 + $0xb60] sm:$0xff]  ;;  %v792_v48 = vld [vmem:[#allocation5 + $0xf70] sm:$0xff] }
 0x1a7   : > { %3190 = vmatprep.subr.bf16.mxu1 %v3189_v59  ;;  %v680_v59 = vld [vmem:[#allocation5 + $0xbf0] sm:$0xff]  ;;  %v3131_v1 = vpack.c.bf16 %v678_v56, %v662_v55  ;;  %v3227_v56 = vpack.c.bf16 %v808_v50, %v792_v48  ;;  %v2175_v48 = vld [vmem:[#allocation8 + $0x8] sm:$0xff] }
 0x1a8   : > { %v936_v15 = vld [vmem:[#allocation5 + $0x13f0] sm:$0xff] }
 0x1a9   : > { %3112 = vmatpush1.bf16.msra.mxu0 %v3111_v3  ;;  %v3211_v3 = vpack.c.bf16 %v680_v59, %v664_v57  ;;  %v838_v59 = vld [vmem:[#allocation5 + $0x10e0] sm:$0xff] }
 0x1aa   : > { %3192 = vmatpush1.bf16.msra.mxu1 %v3191_v4  ;;  %3114 = vmatprep.subr.bf16.mxu0 %v3113_v5  ;;  %v3133_v4 = vpack.c.bf16 %v711_v61, %v695_v60  ;;  %v694_v5 = vld [vmem:[#allocation5 + $0xc60] sm:$0xff]  ;;  %v824_v60 = vld [vmem:[#allocation5 + $0x1070] sm:$0xff] }
 0x1ab   : > { %3194 = vmatprep.subr.bf16.mxu1 %v3193_v9  ;;  %v712_v9 = vld [vmem:[#allocation5 + $0xcf0] sm:$0xff]  ;;  %v3135_v17 = vpack.c.bf16 %v710_v6, %v694_v5  ;;  %v3231_v6 = vpack.c.bf16 %v840_v62, %v824_v60  ;;  %v2177_v60 = vld [vmem:[#allocation8 + $0x18] sm:$0xff] }
 0x1ad   : > { %3116 = vmatpush1.bf16.msra.mxu0 %v3115_v18  ;;  %v3215_v18 = vpack.c.bf16 %v712_v9, %v696_v7  ;;  %v870_v9 = vld [vmem:[#allocation5 + $0x11e0] sm:$0xff] }
 0x1ae   : > { %3196 = vmatpush1.bf16.msra.mxu1 %v3195_v19  ;;  %3118 = vmatprep.subr.bf16.mxu0 %v3117_v20  ;;  %v3137_v19 = vpack.c.bf16 %v743_v11, %v727_v10  ;;  %v726_v20 = vld [vmem:[#allocation5 + $0xd60] sm:$0xff]  ;;  %v856_v10 = vld [vmem:[#allocation5 + $0x1170] sm:$0xff] }
 0x1af   : > { %3198 = vmatprep.subr.bf16.mxu1 %v3197_v24  ;;  %v744_v24 = vld [vmem:[#allocation5 + $0xdf0] sm:$0xff]  ;;  %v3139_v29 = vpack.c.bf16 %v742_v21, %v726_v20  ;;  %v3235_v21 = vpack.c.bf16 %v872_v12, %v856_v10  ;;  %v2179_v10 = vld [vmem:[#allocation8 + $0x28] sm:$0xff] }
 0x1b0   : > { %v2211_v12 = vld [vmem:[#allocation8 + $0x128] sm:$0xff] }
 0x1b1   : > { %3120 = vmatpush1.bf16.msra.mxu0 %v3119_v30  ;;  %v3219_v30 = vpack.c.bf16 %v744_v24, %v728_v23  ;;  %v902_v24 = vld [vmem:[#allocation5 + $0x12e0] sm:$0xff] }
 0x1b2   : > { %3200 = vmatpush1.bf16.msra.mxu1 %v3199_v31  ;;  %3122 = vmatprep.subr.bf16.mxu0 %v3121_v22  ;;  %v3141_v31 = vpack.c.bf16 %v775_v26, %v759_v25  ;;  %v758_v22 = vld [vmem:[#allocation5 + $0xe60] sm:$0xff]  ;;  %v888_v25 = vld [vmem:[#allocation5 + $0x1270] sm:$0xff] }
 0x1b3   : > { %3202 = vmatprep.subr.bf16.mxu1 %v3201_v35  ;;  %v3221_v35 = vpack.c.bf16 %v777_v28, %v761_v27  ;;  %v3143_v43 = vpack.c.bf16 %v774_v32, %v758_v22  ;;  %v904_v27 = vld [vmem:[#allocation5 + $0x12f0] sm:$0xff]  ;;  %v919_v28 = vld [vmem:[#allocation5 + $0x1368] sm:$0xff] }
 0x1b4   : > { %v3239_v22 = vpack.c.bf16 %v904_v27, %v888_v25  ;;  %v2213_v27 = vld [vmem:[#allocation8 + $0x138] sm:$0xff] }
 0x1b5   : > { %3124 = vmatpush1.bf16.msra.mxu0 %v3123_v41  ;;  %v793_v41 = vld [vmem:[#allocation5 + $0xf78] sm:$0xff] }
 0x1b6   : > { %3204 = vmatpush1.bf16.msra.mxu1 %v3203_v42  ;;  %3126 = vmatprep.subr.bf16.mxu0 %v3125_v16  ;;  %v809_v42 = vld [vmem:[#allocation5 + $0xff8] sm:$0xff] }
 0x1b7   : > { %3206 = vmatprep.subr.bf16.mxu1 %v3205_v46  ;;  %v790_v46 = vld [vmem:[#allocation5 + $0xf60] sm:$0xff]  ;;  %v3225_v49 = vpack.c.bf16 %v809_v42, %v793_v41  ;;  %v3243_v42 = vpack.c.bf16 %v936_v15, %v920_v37  ;;  %v2215_v15 = vld [vmem:[#allocation8 + $0x148] sm:$0xff] }
 0x1b8   : > { %v3147_v55 = vpack.c.bf16 %v806_v47, %v790_v46  ;;  %v2223_v46 = vld [vmem:[#allocation8 + $0x188] sm:$0xff]  ;;  %v2174_v47 = vld [vmem:[#allocation8] sm:$0xff] }
 0x1b9   : > { %3128 = vmatpush1.bf16.msra.mxu0 %v3127_v52  ;;  %v839_v52 = vld [vmem:[#allocation5 + $0x10e8] sm:$0xff]  ;;  %v3247_v50 = vpack.c.bf16 %v2175_v48, %v2174_v47  ;;  %v2184_v47 = vld [vmem:[#allocation8 + $0x50] sm:$0xff] }
 0x1ba   : > { %3208 = vmatpush1.bf16.msra.mxu1 %v3207_v53  ;;  %3130 = vmatprep.subr.bf16.mxu0 %v3129_v54  ;;  %v825_v53 = vld [vmem:[#allocation5 + $0x1078] sm:$0xff]  ;;  %v3149_v57 = vpack.c.bf16 %v839_v52, %v823_v51  ;;  %v2206_v51 = vld [vmem:[#allocation8 + $0x100] sm:$0xff]  ;;  %v2185_v48 = vld [vmem:[#allocation8 + $0x58] sm:$0xff] }
 0x1bb   : > { %3210 = vmatprep.subr.bf16.mxu1 %v3209_v58  ;;  %v841_v54 = vld [vmem:[#allocation5 + $0x10f8] sm:$0xff]  ;;  %v822_v58 = vld [vmem:[#allocation5 + $0x1060] sm:$0xff] }
 0x1bc   : > { %v3229_v61 = vpack.c.bf16 %v841_v54, %v825_v53  ;;  %v3151_v5 = vpack.c.bf16 %v838_v59, %v822_v58  ;;  %v2207_v52 = vld [vmem:[#allocation8 + $0x108] sm:$0xff]  ;;  %v2192_v53 = vld [vmem:[#allocation8 + $0x90] sm:$0xff] }
 0x1bd   : > { %3132 = vmatpush1.bf16.msra.mxu0 %v3131_v1  ;;  %v871_v1 = vld [vmem:[#allocation5 + $0x11e8] sm:$0xff]  ;;  %v3279_v54 = vpack.c.bf16 %v2207_v52, %v2206_v51  ;;  %v2176_v59 = vld [vmem:[#allocation8 + $0x10] sm:$0xff]  ;;  %v2202_v52 = vld [vmem:[#allocation8 + $0xe0] sm:$0xff] }
 0x1be   : > { %3212 = vmatpush1.bf16.msra.mxu1 %v3211_v3  ;;  %3134 = vmatprep.subr.bf16.mxu0 %v3133_v4  ;;  %v857_v3 = vld [vmem:[#allocation5 + $0x1178] sm:$0xff]  ;;  %v3153_v7 = vpack.c.bf16 %v871_v1, %v855_v63  ;;  %v3251_v62 = vpack.c.bf16 %v2177_v60, %v2176_v59  ;;  %v2209_v63 = vld [vmem:[#allocation8 + $0x118] sm:$0xff]  ;;  %v2194_v1 = vld [vmem:[#allocation8 + $0xa0] sm:$0xff]  ;;  %v942_v59 = vlaneseq }
 0x1bf   : > { %3214 = vmatprep.subr.bf16.mxu1 %v3213_v8  ;;  %v873_v4 = vld [vmem:[#allocation5 + $0x11f8] sm:$0xff]  ;;  %v854_v8 = vld [vmem:[#allocation5 + $0x1160] sm:$0xff]  ;;  %v2217_v51 = vld [vmem:[#allocation8 + $0x158] sm:$0xff] }
 0x1c0   : > { %v3233_v11 = vpack.c.bf16 %v873_v4, %v857_v3  ;;  %v3155_v20 = vpack.c.bf16 %v870_v9, %v854_v8  ;;  %v2195_v3 = vld [vmem:[#allocation8 + $0xa8] sm:$0xff]  ;;  %v2178_v8 = vld [vmem:[#allocation8 + $0x20] sm:$0xff]  ;;  %v3986_v60 = vshrl.u32 %v942_v59, 7 }
 0x1c1   : > { %3136 = vmatpush1.bf16.msra.mxu0 %v3135_v17  ;;  %v903_v17 = vld [vmem:[#allocation5 + $0x12e8] sm:$0xff] }
 0x1c2   : > { %3216 = vmatpush1.bf16.msra.mxu1 %v3215_v18  ;;  %3138 = vmatprep.subr.bf16.mxu0 %v3137_v19  ;;  %v889_v18 = vld [vmem:[#allocation5 + $0x1278] sm:$0xff]  ;;  %v3157_v23 = vpack.c.bf16 %v903_v17, %v887_v13  ;;  %v3255_v13 = vpack.c.bf16 %v2179_v10, %v2178_v8  ;;  %v2196_v17 = vld [vmem:[#allocation8 + $0xb0] sm:$0xff] }
 0x1c3   : > { %v3970_v34 = vpop.f32.mrb[0].mxu0  ;;  %3218 = vmatprep.subr.bf16.mxu1 %v3217_v2  ;;  %v905_v19 = vld [vmem:[#allocation5 + $0x12f8] sm:$0xff]  ;;  %v886_v2 = vld [vmem:[#allocation5 + $0x1260] sm:$0xff] }
 0x1c4   : > { %v3972_v38 = vpop.f32.mrb[0].mxu1  ;;  %v3974_v40 = vpop.f32.mrb[1].mxu0  ;;  %v3237_v26 = vpack.c.bf16 %v905_v19, %v889_v18  ;;  %v2197_v18 = vld [vmem:[#allocation8 + $0xb8] sm:$0xff]  ;;  %v2228_v19 = vld [vmem:[#allocation8 + $0x1b0] sm:$0xff] }
 0x1c5   : > { %v3976_v16 = vpop.f32.mrb[1].mxu1  ;;  %3140 = vmatpush1.bf16.msra.mxu0 %v3139_v29  ;;  %v935_v29 = vld [vmem:[#allocation5 + $0x13e8] sm:$0xff] }
 0x1c6   : > { %3220 = vmatpush1.bf16.msra.mxu1 %v3219_v30  ;;  %3142 = vmatprep.subr.bf16.mxu0 %v3141_v31  ;;  %v921_v30 = vld [vmem:[#allocation5 + $0x1378] sm:$0xff]  ;;  %v3161_v32 = vpack.c.bf16 %v935_v29, %v919_v28  ;;  %v2198_v28 = vld [vmem:[#allocation8 + $0xc0] sm:$0xff] }
 0x1c7   : > { %3222 = vmatprep.subr.bf16.mxu1 %v3221_v35  ;;  %v937_v31 = vld [vmem:[#allocation5 + $0x13f8] sm:$0xff]  ;;  %v934_v35 = vld [vmem:[#allocation5 + $0x13e0] sm:$0xff] }
 0x1c8   : > { %v3241_v36 = vpack.c.bf16 %v937_v31, %v921_v30  ;;  %v3163_v41 = vpack.c.bf16 %v934_v35, %v918_v33  ;;  %v2199_v29 = vld [vmem:[#allocation8 + $0xc8] sm:$0xff]  ;;  %v2230_v30 = vld [vmem:[#allocation8 + $0x1c0] sm:$0xff] }
 0x1c9   : > { %3144 = vmatpush1.bf16.msra.mxu0 %v3143_v43  ;;  %v2191_v43 = vld [vmem:[#allocation8 + $0x88] sm:$0xff]  ;;  %v2182_v33 = vld [vmem:[#allocation8 + $0x40] sm:$0xff] }
 0x1ca   : > { %3224 = vmatpush1.bf16.msra.mxu1 %v3223_v44  ;;  %3146 = vmatprep.subr.bf16.mxu0 %v3145_v45  ;;  %v2222_v44 = vld [vmem:[#allocation8 + $0x180] sm:$0xff]  ;;  %v2231_v31 = vld [vmem:[#allocation8 + $0x1c8] sm:$0xff] }
 0x1cb   : > { %3226 = vmatprep.subr.bf16.mxu1 %v3225_v49  ;;  %v3277_v49 = vpack.c.bf16 %v2223_v46, %v2222_v44  ;;  %v2183_v35 = vld [vmem:[#allocation8 + $0x48] sm:$0xff]  ;;  %v3293_v37 = vpack.c.bf16 %v2231_v31, %v2230_v30 }
 0x1cc   : > { %v3263_v44 = vpack.c.bf16 %v2183_v35, %v2182_v33  ;;  %v2186_v33 = vld [vmem:[#allocation8 + $0x60] sm:$0xff]  ;;  %v2187_v35 = vld [vmem:[#allocation8 + $0x68] sm:$0xff] }
 0x1cd   : > { %3148 = vmatpush1.bf16.msra.mxu0 %v3147_v55  ;;  %v2193_v55 = vld [vmem:[#allocation8 + $0x98] sm:$0xff] }
 0x1ce   : > { %3228 = vmatpush1.bf16.msra.mxu1 %v3227_v56  ;;  %3150 = vmatprep.subr.bf16.mxu0 %v3149_v57  ;;  %v2224_v56 = vld [vmem:[#allocation8 + $0x190] sm:$0xff]  ;;  %v2225_v57 = vld [vmem:[#allocation8 + $0x198] sm:$0xff] }
 0x1cf   : > { %3230 = vmatprep.subr.bf16.mxu1 %v3229_v61  ;;  %v3281_v58 = vpack.c.bf16 %v2225_v57, %v2224_v56  ;;  %v2208_v61 = vld [vmem:[#allocation8 + $0x110] sm:$0xff]  ;;  %v3267_v56 = vpack.c.bf16 %v2185_v48, %v2184_v47  ;;  %v2221_v47 = vld [vmem:[#allocation8 + $0x178] sm:$0xff] }
 0x1d0   : > { %1943 = vmatmul.mubr.f32.vlgmr.msra.gmra.mrb[6].mxu0 %v3955_v14  ;;  %v3283_v4 = vpack.c.bf16 %v2209_v63, %v2208_v61  ;;  %v944_v61 = vsub.s32 0, %v3986_v60  ;;  %v938_v63 = vld [vmem:[#allocation7] sm:$0xff] }
 0x1d1   : > { %3152 = vmatpush1.bf16.msra.mxu0 %v3151_v5  ;;  %2085 = vmatmul.mubr.f32.vlgmr.msra.gmra.mrb[6].mxu1 %v3955_v14  ;;  %v3159_v14 = vpack.c.bf16 %v902_v24, %v886_v2  ;;  %v3253_v5 = vpack.c.bf16 %v2195_v3, %v2194_v1  ;;  %v2180_v2 = vld [vmem:[#allocation8 + $0x30] sm:$0xff]  ;;  %v2181_v24 = vld [vmem:[#allocation8 + $0x38] sm:$0xff]  ;;  %v952_v1 = vsub.s32 2, %v3986_v60  ;;  %v948_v3 = vsub.s32 1, %v3986_v60 }
 0x1d2   : > { %3232 = vmatpush1.bf16.msra.mxu1 %v3231_v6  ;;  %3154 = vmatprep.subr.bf16.mxu0 %v3153_v7  ;;  %v2226_v6 = vld [vmem:[#allocation8 + $0x1a0] sm:$0xff]  ;;  %v2227_v7 = vld [vmem:[#allocation8 + $0x1a8] sm:$0xff]  ;;  %v945_v8 = vrot.slane %v938_v63, %v944_v61 }
 0x1d3   : > { %3234 = vmatprep.subr.bf16.mxu1 %v3233_v11  ;;  %2013 = vmatprep.mubr.f32.mxu0 %v3664_v39  ;;  %v3285_v9 = vpack.c.bf16 %v2227_v7, %v2226_v6  ;;  %v2210_v11 = vld [vmem:[#allocation8 + $0x120] sm:$0xff]  ;;  %v956_v6 = vsub.s32 3, %v3986_v60  ;;  %v972_v7 = vsub.s32 7, %v3986_v60  ;;  %v953_v10 = vrot.slane %v938_v63, %v952_v1 }
 0x1d4   : > { %2155 = vmatprep.mubr.f32.mxu1 %v3664_v39  ;;  %v2190_v39 = vld [vmem:[#allocation8 + $0x80] sm:$0xff] }
 0x1d5   : > { %3156 = vmatpush1.bf16.msra.mxu0 %v3155_v20  ;;  %v3245_v45 = vpack.c.bf16 %v2191_v43, %v2190_v39  ;;  %v3287_v20 = vpack.c.bf16 %v2211_v12, %v2210_v11  ;;  %v2232_v39 = vld [vmem:[#allocation8 + $0x1d0] sm:$0xff]  ;;  %v2233_v43 = vld [vmem:[#allocation8 + $0x1d8] sm:$0xff]  ;;  %v949_v11 = vrot.slane %v938_v63, %v948_v3 }
 0x1d6   : > { %3236 = vmatpush1.bf16.msra.mxu1 %v3235_v21  ;;  %3158 = vmatprep.subr.bf16.mxu0 %v3157_v23  ;;  %v3257_v21 = vpack.c.bf16 %v2197_v18, %v2196_v17  ;;  %v2229_v23 = vld [vmem:[#allocation8 + $0x1b8] sm:$0xff]  ;;  %v957_v17 = vrot.slane %v938_v63, %v956_v6  ;;  %v973_v18 = vrot.slane %v938_v63, %v972_v7 }
 0x1d7   : > { %3238 = vmatprep.subr.bf16.mxu1 %v3237_v26  ;;  %v3289_v25 = vpack.c.bf16 %v2229_v23, %v2228_v19  ;;  %v2212_v26 = vld [vmem:[#allocation8 + $0x130] sm:$0xff] }
 0x1d9   : > { %3160 = vmatpush1.bf16.msra.mxu0 %v3159_v14  ;;  %v3259_v14 = vpack.c.bf16 %v2181_v24, %v2180_v2  ;;  %v3311_v24 = vadd.f32 %v3972_v38, %v953_v10  ;;  %v2204_v38 = vld [vmem:[#allocation8 + $0xf0] sm:$0xff] }
 0x1da   : > { %3240 = vmatpush1.bf16.msra.mxu1 %v3239_v22  ;;  %3162 = vmatprep.subr.bf16.mxu0 %v3161_v32  ;;  %v3291_v22 = vpack.c.bf16 %v2213_v27, %v2212_v26  ;;  %v3261_v32 = vpack.c.bf16 %v2199_v29, %v2198_v28  ;;  %v3312_v29 = vadd.f32 %v3976_v16, %v957_v17  ;;  %v2189_v16 = vld [vmem:[#allocation8 + $0x78] sm:$0xff] }
 0x1db   : > { %3242 = vmatprep.subr.bf16.mxu1 %v3241_v36  ;;  %v2214_v36 = vld [vmem:[#allocation8 + $0x140] sm:$0xff] }
 0x1dd   : > { %3164 = vmatpush1.bf16.msra.mxu0 %v3163_v41  ;;  %v2200_v41 = vld [vmem:[#allocation8 + $0xd0] sm:$0xff] }
 0x1de   : > { %3244 = vmatpush1.bf16.msra.mxu1 %v3243_v42  ;;  %3246 = vmatprep.subr.bf16.mxu0 %v3245_v45  ;;  %v2201_v42 = vld [vmem:[#allocation8 + $0xd8] sm:$0xff]  ;;  %v3295_v45 = vpack.c.bf16 %v2215_v15, %v2214_v36  ;;  %v3271_v36 = vpack.c.bf16 %v2187_v35, %v2186_v33 }
 0x1df   : > { %3278 = vmatprep.subr.bf16.mxu1 %v3277_v49  ;;  %v3265_v46 = vpack.c.bf16 %v2201_v42, %v2200_v41  ;;  %v2216_v49 = vld [vmem:[#allocation8 + $0x150] sm:$0xff]  ;;  %v2205_v41 = vld [vmem:[#allocation8 + $0xf8] sm:$0xff] }
 0x1e0   : > { %2528 = vmatmul.mubr.msk.f32.vlgmr.msra.gmra.mrb[6].mxu0 %vm1022_vm0, %v3962_v0  ;;  %v3299_v57 = vpack.c.bf16 %v2217_v51, %v2216_v49  ;;  %v3273_v42 = vpack.c.bf16 %v2205_v41, %v2204_v38  ;;  %v939_v49 = vld [vmem:[#allocation7 + $0x8] sm:$0xff] }
 0x1e1   : > { %2529 = vmatmul.mubr.msk.f32.vlgmr.msra.gmra.mrb[6].mxu1 %vm1022_vm0, %v3962_v0  ;;  %3248 = vmatpush3.bf16.msra.mxu0 %v3247_v50  ;;  %v3249_v0 = vpack.c.bf16 %v2193_v55, %v2192_v53  ;;  %v3297_v50 = vpack.c.bf16 %v2233_v43, %v2232_v39  ;;  %v2203_v53 = vld [vmem:[#allocation8 + $0xe8] sm:$0xff]  ;;  %v2237_v39 = vld [vmem:[#allocation8 + $0x1f8] sm:$0xff]  ;;  %v2188_v43 = vld [vmem:[#allocation8 + $0x70] sm:$0xff]  ;;  %v985_v51 = vrot.slane %v939_v49, %v952_v1 }
 0x1e2   : > { %3280 = vmatpush3.bf16.msra.mxu1 %v3279_v54  ;;  %v2234_v54 = vld [vmem:[#allocation8 + $0x1e0] sm:$0xff]  ;;  %v2235_v55 = vld [vmem:[#allocation8 + $0x1e8] sm:$0xff] }
 0x1e3   : > { %3250 = vmatprep.subr.bf16.mxu0 %v3249_v0  ;;  %3282 = vmatprep.subr.bf16.mxu1 %v3281_v58  ;;  %v3269_v0 = vpack.c.bf16 %v2203_v53, %v2202_v52  ;;  %v3301_v58 = vpack.c.bf16 %v2235_v55, %v2234_v54  ;;  %v981_v52 = vrot.slane %v939_v49, %v948_v3 }
 0x1e4   : > { %v989_v53 = vrot.slane %v939_v49, %v956_v6  ;;  %v1005_v3 = vrot.slane %v939_v49, %v972_v7  ;;  %v2530_v7 = vld [vmem:[#allocation10] ss:$0 sm:$0xff] }
 0x1e5   : > { %3252 = vmatpush3.bf16.msra.mxu0 %v3251_v62  ;;  %v960_v62 = vsub.s32 4, %v3986_v60 }
 0x1e6   : > { %3284 = vmatpush3.bf16.msra.mxu1 %v3283_v4  ;;  %3254 = vmatprep.subr.bf16.mxu0 %v3253_v5  ;;  %v968_v4 = vsub.s32 6, %v3986_v60  ;;  %v964_v5 = vsub.s32 5, %v3986_v60 }
 0x1e7   : > { %3286 = vmatprep.subr.bf16.mxu1 %v3285_v9  ;;  %v961_v9 = vrot.slane %v938_v63, %v960_v62 }
 0x1e8   : > { %v969_v12 = vrot.slane %v938_v63, %v968_v4  ;;  %v997_v1 = vrot.slane %v939_v49, %v964_v5 }
 0x1e9   : > { %3256 = vmatpush3.bf16.msra.mxu0 %v3255_v13  ;;  %v965_v13 = vrot.slane %v938_v63, %v964_v5 }
 0x1ea   : > { %3288 = vmatpush3.bf16.msra.mxu1 %v3287_v20  ;;  %3258 = vmatprep.subr.bf16.mxu0 %v3257_v21  ;;  %v3309_v20 = vadd.f32 %v3970_v34, %v945_v8  ;;  %v2218_v34 = vld [vmem:[#allocation8 + $0x160] sm:$0xff] }
 0x1eb   : > { %3290 = vmatprep.subr.bf16.mxu1 %v3289_v25  ;;  %v3310_v25 = vadd.f32 %v3974_v40, %v949_v11  ;;  %v2236_v40 = vld [vmem:[#allocation8 + $0x1f0] sm:$0xff] }
 0x1ed   : > { %3260 = vmatpush3.bf16.msra.mxu0 %v3259_v14 }
 0x1ee   : > { %3292 = vmatpush3.bf16.msra.mxu1 %v3291_v22  ;;  %3262 = vmatprep.subr.bf16.mxu0 %v3261_v32 }
 0x1ef   : > { %3294 = vmatprep.subr.bf16.mxu1 %v3293_v37  ;;  %v2219_v37 = vld [vmem:[#allocation8 + $0x168] sm:$0xff] }
 0x1f0   : > { %v3303_v15 = vpack.c.bf16 %v2219_v37, %v2218_v34 }
 0x1f1   : > { %3264 = vmatpush3.bf16.msra.mxu0 %v3263_v44  ;;  %v3305_v44 = vpack.c.bf16 %v2237_v39, %v2236_v40 }
 0x1f2   : > { %3296 = vmatpush3.bf16.msra.mxu1 %v3295_v45  ;;  %3266 = vmatprep.subr.bf16.mxu0 %v3265_v46  ;;  %v3275_v45 = vpack.c.bf16 %v2189_v16, %v2188_v43  ;;  %v2220_v46 = vld [vmem:[#allocation8 + $0x170] sm:$0xff] }
 0x1f3   : > { %3298 = vmatprep.subr.bf16.mxu1 %v3297_v50  ;;  %v3307_v48 = vpack.c.bf16 %v2221_v47, %v2220_v46  ;;  %v977_v50 = vrot.slane %v939_v49, %v944_v61  ;;  %v1001_v61 = vrot.slane %v939_v49, %v968_v4 }
 0x1f5   : > { %3268 = vmatpush3.bf16.msra.mxu0 %v3267_v56 }
 0x1f6   : > { %3300 = vmatpush3.bf16.msra.mxu1 %v3299_v57  ;;  %3270 = vmatprep.subr.bf16.mxu0 %v3269_v0 }
 0x1f7   : > { %3302 = vmatprep.subr.bf16.mxu1 %v3301_v58 }
 0x1f9   : > { %3272 = vmatpush3.bf16.msra.mxu0 %v3271_v36 }
 0x1fa   : > { %3304 = vmatpush3.bf16.msra.mxu1 %v3303_v15  ;;  %3274 = vmatprep.subr.bf16.mxu0 %v3273_v42 }
 0x1fb   : > { %3306 = vmatprep.subr.bf16.mxu1 %v3305_v44 }
 0x1fd   : > { %3276 = vmatpush3.bf16.msra.mxu0 %v3275_v45 }
 0x1fe   : > { %3308 = vmatpush3.bf16.msra.mxu1 %v3307_v48 }
 0x213   : > { %v1447_v19 = vpop.f32.mrb[2].mxu0 }
 0x214   : > { %v3313_v21 = vadd.f32 %v1447_v19, %v961_v9  ;;  %v1589_v23 = vpop.f32.mrb[2].mxu1  ;;  %v1449_v2 = vpop.f32.mrb[3].mxu0 }
 0x215   : > { %v3315_v26 = vadd.f32 %v1589_v23, %v969_v12  ;;  %v3314_v27 = vadd.f32 %v1449_v2, %v965_v13  ;;  %v1591_v28 = vpop.f32.mrb[3].mxu1  ;;  %v993_v12 = vrot.slane %v939_v49, %v960_v62 }
 0x216   : > { %v2162_v30 = vmul.f32 %v3313_v21, %v3309_v20  ;;  %v3316_v31 = vadd.f32 %v1591_v28, %v973_v18 }
 0x217   : > { %v2164_v14 = vmul.f32 %v3315_v26, %v3311_v24  ;;  %v2163_v22 = vmul.f32 %v3314_v27, %v3310_v25 }
 0x218   : > { %v2165_v32 = vmul.f32 %v3316_v31, %v3312_v29 }
 0x263   : > { %v1731_v54 = vpop.f32.mrb[4].mxu0 }
 0x264   : > { %v3317_v55 = vadd.f32 %v1731_v54, %v977_v50  ;;  %v1873_v56 = vpop.f32.mrb[4].mxu1  ;;  %v1733_v57 = vpop.f32.mrb[5].mxu0 }
 0x265   : > { %v3319_v0 = vadd.f32 %v1873_v56, %v985_v51  ;;  %v3318_v58 = vadd.f32 %v1733_v57, %v981_v52  ;;  %v1875_v59 = vpop.f32.mrb[5].mxu1 }
 0x266   : > { %v2166_v63 = vmul.f32 %v3317_v55, %v2162_v30  ;;  %v3320_v8 = vadd.f32 %v1875_v59, %v989_v53 }
 0x267   : > { %v2168_v9 = vmul.f32 %v3319_v0, %v2164_v14  ;;  %v2167_v10 = vmul.f32 %v3318_v58, %v2163_v22 }
 0x268   : > { %v2169_v11 = vmul.f32 %v3320_v8, %v2165_v32 }
 0x2b3   : > { %v2015_v6 = vpop.f32.mrb[6].mxu0 }
 0x2b4   : > { %v3321_v13 = vadd.f32 %v2015_v6, %v993_v12  ;;  %v2157_v17 = vpop.f32.mrb[6].mxu1  ;;  %v2017_v18 = vpop.f32.mrb[7].mxu0 }
 0x2b5   : > { %v3323_v19 = vadd.f32 %v2157_v17, %v1001_v61  ;;  %v3322_v20 = vadd.f32 %v2017_v18, %v997_v1  ;;  %v2159_v21 = vpop.f32.mrb[7].mxu1 }
 0x2b6   : > { %v2170_v23 = vmul.f32 %v3321_v13, %v2166_v63  ;;  %v3324_v2 = vadd.f32 %v2159_v21, %v1005_v3 }
 0x2b7   : > { %v2172_v62 = vmul.f32 %v3323_v19, %v2168_v9  ;;  %v2171_v24 = vmul.f32 %v3322_v20, %v2167_v10 }
 0x2b8   : > { %v2173_v4 = vmul.f32 %v3324_v2, %v2169_v11 }
 0x2b9   : > { %2309 = vmatprep.mubr.f32.mxu0 %v2171_v24 }
 0x2ba   : > { %2379 = vmatprep.mubr.f32.mxu1 %v2173_v4  ;;  %2310 = vmatmul.mubr.f32.vlgmr.msra.gmra.mrb[8].mxu0 %v2170_v23 }
 0x2bb   : > { %2380 = vmatmul.mubr.f32.vlgmr.msra.gmra.mrb[8].mxu1 %v2172_v62 }
 0x38d   : > { %v2567_v60 = vpop.f32.mrb[8].mxu0 }
 0x38e   : > { %v2602_v5 = vpop.f32.mrb[8].mxu1  ;;  %v2568_v25 = vpop.f32.mrb[9].mxu0 }
 0x38f   : > { %v2569_v26 = vadd.f32 %v2568_v25, %v2567_v60  ;;  %v2603_v27 = vpop.f32.mrb[9].mxu1 }
 0x390   : > { %v2604_v28 = vadd.f32 %v2603_v27, %v2602_v5 }
 0x391   : > { %v2312_v29 = vadd.f32 %v2569_v26, %v2530_v7 }
 0x393   : > { %v2382_v30 = vadd.f32 %v2604_v28, %v2312_v29 }
 0x395   : > { %2385 = vst [vmem:[%s294_s13] sm:$0xff] %v2382_v30 }
 0x396   : > { %3593 = shalt.err (!%p3590_p3)
}
 0x397   : > { %s3594_s29 = scalar_lea.hbm %s4021_s14, 128  ;;  %s3598_s8 = scalar_lea.hbm %s4070_s5, 256 }
 0x398   : > { %p3595_p13 = scmp.ne.s32.totalorder %s4021_s14, %s3594_s29  ;;  %p3599_p9 = scmp.lt.u32.totalorder %s4021_s14, %s4070_s5 }
 0x399   : > { %p3600_p4 = scmp.lt.u32.totalorder %s3598_s8, %s3594_s29  ;;  %p3602_p2 = scmp.lt.u32.totalorder %s3594_s29, %s4021_s14 }
 0x39a   : > { %p3596_p12 = pnand %p3595_p13, %p4087_p0 }
 0x39b   : > { %p3601_p8 = por %p3600_p4, %p3599_p9 }
 0x39c   : > { %p3597_p6 = pneg %p3596_p12 }
 0x39d   : > { %p3603_p5 = por %p3602_p2, %p3601_p8 }
 0x39f   : > { %p3604_p7 = pnand %p3603_p5, %p3597_p6 }
 0x3a1   : > { %3607 = shalt.err (!%p3604_p7)
}
 0x3a2   : > { %3362 = dma.vmem_to_hbm [thread:$0]  (%p4087_p0), %s4023_s26, 128, %s4021_s14, %s2387_s15  }
 0x3a3 PF: > { %s2412_s16 = sand.u32 1, %s3642_s18   ;;  %p4088_p10 = scmp.ne.s32.totalorder %s4080_s23, 0 }
 0x3a4   : > { %p4089_p11 = scmp.ge.s32.totalorder %s3654_s21, 2  ;;  %s2413_s13 = scalar_lea.sflag [#allocation4], %s2412_s16 }
 0x3a6   : > { %p3382_p1 = pnand %p4089_p11, %p4088_p10 }
 0x3a8   : > { %3637 = dma.done.wait (!%p3382_p1), %s2413_s13, 128  }
 0x3a9   : > { %3639 = vsyncadd (!%p3382_p1), %s2413_s13, 4294967168  ;;  %p20_p3 = scmp.ge.s32.totalorder %s3832_s28, 4   ;;  %s4090_s18 = smov %s3646_s19 }
 0x3aa   : > { %s4091_s19 = smov %s3650_s20  ;;  %s4092_s20 = smov %s3844_s27 }
 0x3ab   : > { %s4093_s21 = smov %s3832_s28  ;;  %22 = sbr.rel (!%p20_p3) target bundleno = 7 (0x7), region = 101 }
 0x3b2   :  { %2418 = vsyncpa [#allocation3], 1 }
 0x3b3   :  { %2420 = vsyncpa [#allocation3 + $0x1], 1 }
 0x3b4   :  { %2421 = vsyncpa [#allocation6], 1 }
 0x3b5   :  { %2422 = vsyncpa [#allocation9], 1 }
 0x3b6   :  { %2423 = vsyncpa [#allocation4], 1 }
 0x3b7   :  { %2425 = vsyncpa [#allocation4 + $0x1], 1 }

</bundles_post_ra>
